<compile_context>
chip_gen: v7x
topology: tpu7x:2x2x1
jax: 0.10.0
libtpu: 0.0.40
codegen_flags: <defaults>
</compile_context>

<pallas_src>
import jax
import jax.numpy as jnp
from jax.experimental import pallas as pl
from jax.experimental.pallas import tpu as pltpu


def _round_up(v, m):
    return (v + m - 1) // m * m


# ----------------------------- Pallas kernels ------------------------------

def _matmul_shift_relu_single_kernel(p_ref, w_ref, s_ref, o_ref):
    """relu(P @ W + shift) for a (tm, tn) tile, single K step (no scratch)."""
    acc = jnp.dot(p_ref[...], w_ref[...], preferred_element_type=jnp.float32)
    o_ref[...] = jnp.maximum(acc + s_ref[...], 0.0)


def _matmul_shift_relu_acc_kernel(p_ref, w_ref, s_ref, o_ref, acc_ref):
    """Same, accumulated over a K grid axis (used only for very large K)."""
    k = pl.program_id(2)

    @pl.when(k == 0)
    def _():
        acc_ref[...] = jnp.zeros_like(acc_ref)

    acc_ref[...] += jnp.dot(p_ref[...], w_ref[...],
                            preferred_element_type=jnp.float32)

    @pl.when(k == pl.num_programs(2) - 1)
    def _():
        o_ref[...] = jnp.maximum(acc_ref[...] + s_ref[...], 0.0)


# --------------------------- tiled matmul wrapper ---------------------------

def _pick_tiles(m, k, c_out):
    """Tile/grid selection (all Python ints at trace time)."""
    # N (output-channel) axis: lane-dense multiple of 128; full-N tile when
    # it fits so the patch operand is DMA'd from HBM once.
    n_pad = _round_up(c_out, 128)
    if n_pad <= 512:
        tn = n_pad
    elif n_pad % 512 == 0:
        tn = 512
    elif n_pad % 256 == 0:
        tn = 256
    else:
        tn = 128
    gn = n_pad // tn

    # K (reduction) axis: always lane-dense (multiple of 128); single K step
    # whenever it fits comfortably in VMEM, else tk=512.
    k_pad = _round_up(k, 128)
    if k_pad <= 2048:
        tk = k_pad
    else:
        k_pad = _round_up(k, 512)
        tk = 512
    gk = k_pad // tk

    # M (rows) axis: big tiles; but keep >=2 blocks on the parallel axes so
    # v7x's two TensorCores both get work when gn == 1.
    tm = min(512, _round_up(m, 8))
    if gn == 1 and m > 8 and _round_up(m, tm) // tm < 2:
        tm = _round_up((m + 1) // 2, 8)
    m_pad = _round_up(m, tm)
    gm = m_pad // tm
    return tm, tn, tk, gm, gn, gk, m_pad, n_pad, k_pad


def _matmul_shift_relu(patches, wmat, shift):
    """relu(patches @ wmat + shift).

    patches: (M, K) f32; wmat: (K, C_out) bf16 (BN scale pre-folded);
    shift:   (C_out,) f32.  Returns (M, C_out) f32.
    """
    m, k = patches.shape
    c_out = wmat.shape[1]
    tm, tn, tk, gm, gn, gk, m_pad, n_pad, k_pad = _pick_tiles(m, k, c_out)

    # bf16 operands for the MXU; zero padding to lane/sublane-dense shapes.
    p = jnp.pad(patches.astype(jnp.bfloat16),
                ((0, m_pad - m), (0, k_pad - k)))
    w = jnp.pad(wmat.astype(jnp.bfloat16),
                ((0, k_pad - k), (0, n_pad - c_out)))
    s = jnp.pad(shift.astype(jnp.float32).reshape(1, c_out),
                ((0, 0), (0, n_pad - c_out)))

    cost = pl.CostEstimate(
        flops=2 * m_pad * k_pad * n_pad,
        transcendentals=0,
        bytes_accessed=2 * (p.size + w.size) + 4 * (s.size + m_pad * n_pad))

    if gk == 1:
        out = pl.pallas_call(
            _matmul_shift_relu_single_kernel,
            out_shape=jax.ShapeDtypeStruct((m_pad, n_pad), jnp.float32),
            grid_spec=pltpu.PrefetchScalarGridSpec(
                num_scalar_prefetch=0,
                grid=(gm, gn),
                in_specs=[
                    pl.BlockSpec((tm, tk), lambda i, j: (i, 0)),
                    pl.BlockSpec((tk, tn), lambda i, j: (0, j)),
                    pl.BlockSpec((1, tn), lambda i, j: (0, j)),
                ],
                out_specs=pl.BlockSpec((tm, tn), lambda i, j: (i, j)),
            ),
            compiler_params=pltpu.CompilerParams(
                dimension_semantics=("parallel", "parallel")),
            cost_estimate=cost,
        )(p, w, s)
    else:
        out = pl.pallas_call(
            _matmul_shift_relu_acc_kernel,
            out_shape=jax.ShapeDtypeStruct((m_pad, n_pad), jnp.float32),
            grid_spec=pltpu.PrefetchScalarGridSpec(
                num_scalar_prefetch=0,
                grid=(gm, gn, gk),
                in_specs=[
                    pl.BlockSpec((tm, tk), lambda i, j, kk: (i, kk)),
                    pl.BlockSpec((tk, tn), lambda i, j, kk: (kk, j)),
                    pl.BlockSpec((1, tn), lambda i, j, kk: (0, j)),
                ],
                out_specs=pl.BlockSpec((tm, tn), lambda i, j, kk: (i, j)),
                scratch_shapes=[pltpu.VMEM((tm, tn), jnp.float32)],
            ),
            compiler_params=pltpu.CompilerParams(
                dimension_semantics=("parallel", "parallel", "arbitrary")),
            cost_estimate=cost,
        )(p, w, s)

    return out[:m, :c_out]


# ------------------------------- conv blocks --------------------------------

def _im2col_nhwc(x, kh, kw, stride, padding):
    """x: (N, H, W, C) -> patches (N*OH*OW, KH*KW*C) in (kh, kw, C) K-order."""
    n, h, w, c = x.shape
    xp = jnp.pad(x, ((0, 0), (padding, padding), (padding, padding), (0, 0)))
    oh = (h + 2 * padding - kh) // stride + 1
    ow = (w + 2 * padding - kw) // stride + 1
    cols = []
    for i in range(kh):
        for j in range(kw):
            cols.append(xp[:, i:i + stride * (oh - 1) + 1:stride,
                              j:j + stride * (ow - 1) + 1:stride, :])
    p = jnp.stack(cols, axis=3)                  # (N, OH, OW, KH*KW, C)
    return p.reshape(n * oh * ow, kh * kw * c), oh, ow


def conv_bn_relu_nhwc(x, folded, kernel_size, stride, padding):
    """ConvBlock: conv + eval-BN + ReLU. x: (N,H,W,C_in) -> (N,OH,OW,C_out)."""
    wmat, shift = folded
    c_out = wmat.shape[1]
    n, _, _, c_in = x.shape

    if kernel_size == 1 and stride == 1 and padding == 0:
        oh, ow = x.shape[1], x.shape[2]
        patches = x.reshape(n * oh * ow, c_in)           # skip im2col for 1x1
    else:
        patches, oh, ow = _im2col_nhwc(x, kernel_size, kernel_size,
                                       stride, padding)

    out = _matmul_shift_relu(patches, wmat, shift)
    return out.reshape(n, oh, ow, c_out)


def maxpool2d_3x3_s2_nhwc(x):
    """nn.MaxPool2d(3, stride=2, padding=0). x: (N, H, W, C) NHWC.

    Left to XLA fusion on purpose: a 9-way elementwise max of strided slices
    fuses into a single memory-bound pass; a Pallas version only adds HBM
    staging glue at these sizes.
    """
    n, h, w, c = x.shape
    oh = (h - 3) // 2 + 1
    ow = (w - 3) // 2 + 1
    out = None
    for i in range(3):
        for j in range(3):
            win = x[:, i:i + 2 * (oh - 1) + 1:2,
                       j:j + 2 * (ow - 1) + 1:2, :]
            out = win if out is None else jnp.maximum(out, win)
    return out


# --------------------------- parameter creation -----------------------------

def init_convblock(key, in_ch, out_ch, ksize):
    kw_, kb, kg, kbt, km, kv = jax.random.split(key, 6)
    fan_in = in_ch * ksize * ksize
    bound = 1.0 / (fan_in ** 0.5)
    w = jax.random.uniform(kw_, (out_ch, in_ch, ksize, ksize),
                           jnp.float32, -bound, bound)
    b = jax.random.uniform(kb, (out_ch,), jnp.float32, -bound, bound)
    gamma = jax.random.uniform(kg, (out_ch,), jnp.float32, 0.5, 1.5)
    beta = jax.random.uniform(kbt, (out_ch,), jnp.float32, -0.1, 0.1)
    rmean = jax.random.uniform(km, (out_ch,), jnp.float32, -0.1, 0.1)
    rvar = jax.random.uniform(kv, (out_ch,), jnp.float32, 0.5, 1.5)
    return (w, b, gamma, beta, rmean, rvar)


def init_inception_red(key, in_channels, f_3x3_r, add_ch=0):
    ks = jax.random.split(key, 5)
    return {
        "b1_1": init_convblock(ks[0], in_channels, f_3x3_r, 1),
        "b1_2": init_convblock(ks[1], f_3x3_r, 178 + add_ch, 3),
        "b1_3": init_convblock(ks[2], 178 + add_ch, 178 + add_ch, 3),
        "b2_1": init_convblock(ks[3], in_channels, f_3x3_r, 1),
        "b2_2": init_convblock(ks[4], f_3x3_r, 302 + add_ch, 3),
    }


def fold_convblock(params):
    """Fold conv bias + eval-mode BN into (bf16 weight matrix, f32 shift)."""
    w, b, gamma, beta, rmean, rvar = params
    c_out = w.shape[0]
    eps = 1e-5
    scale = gamma / jnp.sqrt(rvar + eps)
    shift = (b - rmean) * scale + beta
    # (C_out, C_in, KH, KW) -> (KH*KW*C_in, C_out); fold BN scale into columns.
    wmat = jnp.transpose(w, (2, 3, 1, 0)).reshape(-1, c_out) * scale[None, :]
    return wmat.astype(jnp.bfloat16), shift.astype(jnp.float32)


def fold_inception_red(params):
    """Hoisted once at setup; not re-run inside the jitted forward."""
    return {name: fold_convblock(p) for name, p in params.items()}


# ------------------------------ module forward ------------------------------

def inception_red_forward(x, folded):
    """x: (N, C, H, W) NCHW (PyTorch layout) -> (N, C_total, OH, OW) NCHW."""
    x_nhwc = jnp.transpose(x, (0, 2, 3, 1))          # one layout change in
    # branch1: 1x1 s1 p0 -> 3x3 s1 p1 -> 3x3 s2 p0
    b1 = conv_bn_relu_nhwc(x_nhwc, folded["b1_1"], 1, 1, 0)
    b1 = conv_bn_relu_nhwc(b1, folded["b1_2"], 3, 1, 1)
    b1 = conv_bn_relu_nhwc(b1, folded["b1_3"], 3, 2, 0)
    # branch2: 1x1 s1 p0 -> 3x3 s2 p0
    b2 = conv_bn_relu_nhwc(x_nhwc, folded["b2_1"], 1, 1, 0)
    b2 = conv_bn_relu_nhwc(b2, folded["b2_2"], 3, 2, 0)
    # branch3: maxpool 3x3 s2 p0
    b3 = maxpool2d_3x3_s2_nhwc(x_nhwc)
    out = jnp.concatenate([b1, b2, b3], axis=-1)     # channel concat in NHWC
    return jnp.transpose(out, (0, 3, 1, 2))          # one layout change out


if __name__ == "__main__":
    key = jax.random.PRNGKey(0)
    kx, kp = jax.random.split(key)

    N, C_IN, H, W = 2, 4, 16, 16
    F_3X3_R, ADD_CH = 8, 0

    x = jax.random.normal(kx, (N, C_IN, H, W), jnp.float32)
    params = init_inception_red(kp, C_IN, F_3X3_R, ADD_CH)
    folded = fold_inception_red(params)              # weight fold done once

    fwd = jax.jit(inception_red_forward)
    out = jax.block_until_ready(fwd(x, folded))

    expected_channels = (178 + ADD_CH) + (302 + ADD_CH) + C_IN
    assert out.shape == (N, expected_channels, 7, 7), out.shape
    assert out.dtype == jnp.float32
    print("KERNEL_OK")
</pallas_src>

<mosaic_0001>
module attributes {stable_mosaic.version = 11 : i64} {
  func.func @_matmul_shift_relu_single_kernel(%arg0: i32, %arg1: i32, %arg2: memref<256x128xbf16, #tpu.memory_space<vmem>>, %arg3: memref<128x128xbf16, #tpu.memory_space<vmem>>, %arg4: memref<1x128xf32, #tpu.memory_space<vmem>>, %arg5: memref<256x128xf32, #tpu.memory_space<vmem>>) attributes {dimension_semantics = [#tpu.dimension_semantics<parallel>, #tpu.dimension_semantics<parallel>], iteration_bounds = array<i64: 2, 1>, scalar_prefetch = 0 : i64, scratch_operands = 0 : i64, tpu.core_type = #tpu.core_type<tc>, window_params = [{transform_indices = @transform_0, window_bounds = array<i64: 256, 128>}, {transform_indices = @transform_1, window_bounds = array<i64: 128, 128>}, {transform_indices = @transform_2, window_bounds = array<i64: 1, 128>}, {transform_indices = @transform_3, window_bounds = array<i64: 256, 128>}]} {
    %c0 = arith.constant 0 : index
    %c0_0 = arith.constant 0 : index
    %0 = vector.load %arg2[%c0, %c0_0] : memref<256x128xbf16, #tpu.memory_space<vmem>>, vector<256x128xbf16>
    %c0_1 = arith.constant 0 : index
    %c0_2 = arith.constant 0 : index
    %1 = vector.load %arg3[%c0_1, %c0_2] : memref<128x128xbf16, #tpu.memory_space<vmem>>, vector<128x128xbf16>
    %cst = arith.constant dense<0.000000e+00> : vector<256x128xf32>
    %2 = tpu.matmul %0, %1, %cst {dimension_numbers = #tpu.dot_dimension_numbers<[1], [0], [0], [1], [0, 0, 1, 1], [], []>} : vector<256x128xbf16>, vector<128x128xbf16>, vector<256x128xf32> -> vector<256x128xf32>
    %c0_3 = arith.constant 0 : index
    %c0_4 = arith.constant 0 : index
    %3 = vector.load %arg4[%c0_3, %c0_4] : memref<1x128xf32, #tpu.memory_space<vmem>>, vector<1x128xf32>
    %4 = vector.broadcast %3 : vector<1x128xf32> to vector<256x128xf32>
    %5 = arith.addf %2, %4 : vector<256x128xf32>
    %cst_5 = arith.constant 0.000000e+00 : f32
    %6 = vector.broadcast %cst_5 : f32 to vector<256x128xf32>
    %7 = arith.maximumf %5, %6 : vector<256x128xf32>
    %c0_6 = arith.constant 0 : index
    %c0_7 = arith.constant 0 : index
    %8 = vector.load %arg5[%c0_6, %c0_7] : memref<256x128xf32, #tpu.memory_space<vmem>>, vector<256x128xf32>
    tpu.vector_store %arg5[%c0_6, %c0_7], %7 {strides = array<i32>} : memref<256x128xf32, #tpu.memory_space<vmem>>, vector<256x128xf32>,
    return
  }
  func.func @transform_0(%arg0: i32, %arg1: i32) -> (i32, i32) {
    %c0_i32 = arith.constant 0 : i32
    %c0_i32_0 = arith.constant 0 : i32
    return %arg0, %c0_i32 : i32, i32
  }
  func.func @transform_1(%arg0: i32, %arg1: i32) -> (i32, i32) {
    %c0_i32 = arith.constant 0 : i32
    %c0_i32_0 = arith.constant 0 : i32
    return %c0_i32, %arg1 : i32, i32
  }
  func.func @transform_2(%arg0: i32, %arg1: i32) -> (i32, i32) {
    %c0_i32 = arith.constant 0 : i32
    %c0_i32_0 = arith.constant 0 : i32
    return %c0_i32, %arg1 : i32, i32
  }
  func.func @transform_3(%arg0: i32, %arg1: i32) -> (i32, i32) {
    %c0_i32 = arith.constant 0 : i32
    return %arg0, %arg1 : i32, i32
  }
}

module attributes {stable_mosaic.version = 11 : i64} {
  func.func @_matmul_shift_relu_single_kernel(%arg0: i32, %arg1: i32, %arg2: memref<56x128xbf16, #tpu.memory_space<vmem>>, %arg3: memref<128x384xbf16, #tpu.memory_space<vmem>>, %arg4: memref<1x384xf32, #tpu.memory_space<vmem>>, %arg5: memref<56x384xf32, #tpu.memory_space<vmem>>) attributes {dimension_semantics = [#tpu.dimension_semantics<parallel>, #tpu.dimension_semantics<parallel>], iteration_bounds = array<i64: 2, 1>, scalar_prefetch = 0 : i64, scratch_operands = 0 : i64, tpu.core_type = #tpu.core_type<tc>, window_params = [{transform_indices = @transform_0, window_bounds = array<i64: 56, 128>}, {transform_indices = @transform_1, window_bounds = array<i64: 128, 384>}, {transform_indices = @transform_2, window_bounds = array<i64: 1, 384>}, {transform_indices = @transform_3, window_bounds = array<i64: 56, 384>}]} {
    %c0 = arith.constant 0 : index
    %c0_0 = arith.constant 0 : index
    %0 = vector.load %arg2[%c0, %c0_0] : memref<56x128xbf16, #tpu.memory_space<vmem>>, vector<56x128xbf16>
    %c0_1 = arith.constant 0 : index
    %c0_2 = arith.constant 0 : index
    %1 = vector.load %arg3[%c0_1, %c0_2] : memref<128x384xbf16, #tpu.memory_space<vmem>>, vector<128x384xbf16>
    %cst = arith.constant dense<0.000000e+00> : vector<56x384xf32>
    %2 = tpu.matmul %0, %1, %cst {dimension_numbers = #tpu.dot_dimension_numbers<[1], [0], [0], [1], [0, 0, 1, 1], [], []>} : vector<56x128xbf16>, vector<128x384xbf16>, vector<56x384xf32> -> vector<56x384xf32>
    %c0_3 = arith.constant 0 : index
    %c0_4 = arith.constant 0 : index
    %3 = vector.load %arg4[%c0_3, %c0_4] : memref<1x384xf32, #tpu.memory_space<vmem>>, vector<1x384xf32>
    %4 = vector.broadcast %3 : vector<1x384xf32> to vector<56x384xf32>
    %5 = arith.addf %2, %4 : vector<56x384xf32>
    %cst_5 = arith.constant 0.000000e+00 : f32
    %6 = vector.broadcast %cst_5 : f32 to vector<56x384xf32>
    %7 = arith.maximumf %5, %6 : vector<56x384xf32>
    %c0_6 = arith.constant 0 : index
    %c0_7 = arith.constant 0 : index
    %8 = vector.load %arg5[%c0_6, %c0_7] : memref<56x384xf32, #tpu.memory_space<vmem>>, vector<56x384xf32>
    tpu.vector_store %arg5[%c0_6, %c0_7], %7 {strides = array<i32>} : memref<56x384xf32, #tpu.memory_space<vmem>>, vector<56x384xf32>,
    return
  }
  func.func @transform_0(%arg0: i32, %arg1: i32) -> (i32, i32) {
    %c0_i32 = arith.constant 0 : i32
    %c0_i32_0 = arith.constant 0 : i32
    return %arg0, %c0_i32 : i32, i32
  }
  func.func @transform_1(%arg0: i32, %arg1: i32) -> (i32, i32) {
    %c0_i32 = arith.constant 0 : i32
    %c0_i32_0 = arith.constant 0 : i32
    return %c0_i32, %arg1 : i32, i32
  }
  func.func @transform_2(%arg0: i32, %arg1: i32) -> (i32, i32) {
    %c0_i32 = arith.constant 0 : i32
    %c0_i32_0 = arith.constant 0 : i32
    return %c0_i32, %arg1 : i32, i32
  }
  func.func @transform_3(%arg0: i32, %arg1: i32) -> (i32, i32) {
    %c0_i32 = arith.constant 0 : i32
    return %arg0, %arg1 : i32, i32
  }
}

module attributes {stable_mosaic.version = 11 : i64} {
  func.func @_matmul_shift_relu_single_kernel(%arg0: i32, %arg1: i32, %arg2: memref<256x128xbf16, #tpu.memory_space<vmem>>, %arg3: memref<128x256xbf16, #tpu.memory_space<vmem>>, %arg4: memref<1x256xf32, #tpu.memory_space<vmem>>, %arg5: memref<256x256xf32, #tpu.memory_space<vmem>>) attributes {dimension_semantics = [#tpu.dimension_semantics<parallel>, #tpu.dimension_semantics<parallel>], iteration_bounds = array<i64: 2, 1>, scalar_prefetch = 0 : i64, scratch_operands = 0 : i64, tpu.core_type = #tpu.core_type<tc>, window_params = [{transform_indices = @transform_0, window_bounds = array<i64: 256, 128>}, {transform_indices = @transform_1, window_bounds = array<i64: 128, 256>}, {transform_indices = @transform_2, window_bounds = array<i64: 1, 256>}, {transform_indices = @transform_3, window_bounds = array<i64: 256, 256>}]} {
    %c0 = arith.constant 0 : index
    %c0_0 = arith.constant 0 : index
    %0 = vector.load %arg2[%c0, %c0_0] : memref<256x128xbf16, #tpu.memory_space<vmem>>, vector<256x128xbf16>
    %c0_1 = arith.constant 0 : index
    %c0_2 = arith.constant 0 : index
    %1 = vector.load %arg3[%c0_1, %c0_2] : memref<128x256xbf16, #tpu.memory_space<vmem>>, vector<128x256xbf16>
    %cst = arith.constant dense<0.000000e+00> : vector<256x256xf32>
    %2 = tpu.matmul %0, %1, %cst {dimension_numbers = #tpu.dot_dimension_numbers<[1], [0], [0], [1], [0, 0, 1, 1], [], []>} : vector<256x128xbf16>, vector<128x256xbf16>, vector<256x256xf32> -> vector<256x256xf32>
    %c0_3 = arith.constant 0 : index
    %c0_4 = arith.constant 0 : index
    %3 = vector.load %arg4[%c0_3, %c0_4] : memref<1x256xf32, #tpu.memory_space<vmem>>, vector<1x256xf32>
    %4 = vector.broadcast %3 : vector<1x256xf32> to vector<256x256xf32>
    %5 = arith.addf %2, %4 : vector<256x256xf32>
    %cst_5 = arith.constant 0.000000e+00 : f32
    %6 = vector.broadcast %cst_5 : f32 to vector<256x256xf32>
    %7 = arith.maximumf %5, %6 : vector<256x256xf32>
    %c0_6 = arith.constant 0 : index
    %c0_7 = arith.constant 0 : index
    %8 = vector.load %arg5[%c0_6, %c0_7] : memref<256x256xf32, #tpu.memory_space<vmem>>, vector<256x256xf32>
    tpu.vector_store %arg5[%c0_6, %c0_7], %7 {strides = array<i32>} : memref<256x256xf32, #tpu.memory_space<vmem>>, vector<256x256xf32>,
    return
  }
  func.func @transform_0(%arg0: i32, %arg1: i32) -> (i32, i32) {
    %c0_i32 = arith.constant 0 : i32
    %c0_i32_0 = arith.constant 0 : i32
    return %arg0, %c0_i32 : i32, i32
  }
  func.func @transform_1(%arg0: i32, %arg1: i32) -> (i32, i32) {
    %c0_i32 = arith.constant 0 : i32
    %c0_i32_0 = arith.constant 0 : i32
    return %c0_i32, %arg1 : i32, i32
  }
  func.func @transform_2(%arg0: i32, %arg1: i32) -> (i32, i32) {
    %c0_i32 = arith.constant 0 : i32
    %c0_i32_0 = arith.constant 0 : i32
    return %c0_i32, %arg1 : i32, i32
  }
  func.func @transform_3(%arg0: i32, %arg1: i32) -> (i32, i32) {
    %c0_i32 = arith.constant 0 : i32
    return %arg0, %arg1 : i32, i32
  }
}

module attributes {stable_mosaic.version = 11 : i64} {
  func.func @_matmul_shift_relu_single_kernel(%arg0: i32, %arg1: i32, %arg2: memref<56x1664xbf16, #tpu.memory_space<vmem>>, %arg3: memref<1664x256xbf16, #tpu.memory_space<vmem>>, %arg4: memref<1x256xf32, #tpu.memory_space<vmem>>, %arg5: memref<56x256xf32, #tpu.memory_space<vmem>>) attributes {dimension_semantics = [#tpu.dimension_semantics<parallel>, #tpu.dimension_semantics<parallel>], iteration_bounds = array<i64: 2, 1>, scalar_prefetch = 0 : i64, scratch_operands = 0 : i64, tpu.core_type = #tpu.core_type<tc>, window_params = [{transform_indices = @transform_0, window_bounds = array<i64: 56, 1664>}, {transform_indices = @transform_1, window_bounds = array<i64: 1664, 256>}, {transform_indices = @transform_2, window_bounds = array<i64: 1, 256>}, {transform_indices = @transform_3, window_bounds = array<i64: 56, 256>}]} {
    %c0 = arith.constant 0 : index
    %c0_0 = arith.constant 0 : index
    %0 = vector.load %arg2[%c0, %c0_0] : memref<56x1664xbf16, #tpu.memory_space<vmem>>, vector<56x1664xbf16>
    %c0_1 = arith.constant 0 : index
    %c0_2 = arith.constant 0 : index
    %1 = vector.load %arg3[%c0_1, %c0_2] : memref<1664x256xbf16, #tpu.memory_space<vmem>>, vector<1664x256xbf16>
    %cst = arith.constant dense<0.000000e+00> : vector<56x256xf32>
    %2 = tpu.matmul %0, %1, %cst {dimension_numbers = #tpu.dot_dimension_numbers<[1], [0], [0], [1], [0, 0, 1, 1], [], []>} : vector<56x1664xbf16>, vector<1664x256xbf16>, vector<56x256xf32> -> vector<56x256xf32>
    %c0_3 = arith.constant 0 : index
    %c0_4 = arith.constant 0 : index
    %3 = vector.load %arg4[%c0_3, %c0_4] : memref<1x256xf32, #tpu.memory_space<vmem>>, vector<1x256xf32>
    %4 = vector.broadcast %3 : vector<1x256xf32> to vector<56x256xf32>
    %5 = arith.addf %2, %4 : vector<56x256xf32>
    %cst_5 = arith.constant 0.000000e+00 : f32
    %6 = vector.broadcast %cst_5 : f32 to vector<56x256xf32>
    %7 = arith.maximumf %5, %6 : vector<56x256xf32>
    %c0_6 = arith.constant 0 : index
    %c0_7 = arith.constant 0 : index
    %8 = vector.load %arg5[%c0_6, %c0_7] : memref<56x256xf32, #tpu.memory_space<vmem>>, vector<56x256xf32>
    tpu.vector_store %arg5[%c0_6, %c0_7], %7 {strides = array<i32>} : memref<56x256xf32, #tpu.memory_space<vmem>>, vector<56x256xf32>,
    return
  }
  func.func @transform_0(%arg0: i32, %arg1: i32) -> (i32, i32) {
    %c0_i32 = arith.constant 0 : i32
    %c0_i32_0 = arith.constant 0 : i32
    return %arg0, %c0_i32 : i32, i32
  }
  func.func @transform_1(%arg0: i32, %arg1: i32) -> (i32, i32) {
    %c0_i32 = arith.constant 0 : i32
    %c0_i32_0 = arith.constant 0 : i32
    return %c0_i32, %arg1 : i32, i32
  }
  func.func @transform_2(%arg0: i32, %arg1: i32) -> (i32, i32) {
    %c0_i32 = arith.constant 0 : i32
    %c0_i32_0 = arith.constant 0 : i32
    return %c0_i32, %arg1 : i32, i32
  }
  func.func @transform_3(%arg0: i32, %arg1: i32) -> (i32, i32) {
    %c0_i32 = arith.constant 0 : i32
    return %arg0, %arg1 : i32, i32
  }
}

</mosaic_0001>

<bundles_post_ra>
// kernel: inception_red_forward.8
= control target key start
LH: loop header
LB: loop body
LE: loop exit
PB: predicated region body
PF: predicated region fallthrough
CT: control target
= control target key end

     0   :  { %s970_s12 = smov 0   ;;  %s972_s13 = smov 0   ;;  %s1120_s0 = inlined_call_operand.vmem [shape: bf16[512,128], index: 0, kind: input, shape index: {}]   ;;  %s1121_s1 = inlined_call_operand.vmem [shape: bf16[128,128], index: 1, kind: input, shape index: {}]   ;;  %s1122_s2 = inlined_call_operand.vmem [shape: f32[1,128], index: 2, kind: input, shape index: {}]   ;;  %s1123_s3 = inlined_call_operand.vmem [shape: f32[512,128], index: 3, kind: output, shape index: {}]  }
   0x1   :  { %s974_s14 = smov 0  }
   0x2 LB: > { %s25_s15 = sadd.s32 1, %s944_s13  ;;  %p758_p0 = scmp.ge.s32.totalorder %s948_s14, 1  ;;  %s948_s14 = sphi %s974_s14, %s13_s14   ;;  %s944_s13 = sphi %s972_s13, %s1125_s13   ;;  %s940_s12 = sphi %s970_s12, %s1124_s12  }
   0x3   : > { %p27_p1 = scmp.ge.s32.totalorder %s25_s15, 2  ;;  %p169_p2 = scmp.lt.s32.totalorder %s948_s14, 3 }
   0x5   : > { %s1127_s15 = smov (%p27_p1, %s25_s15), 0  ;;  %p170_p3 = pnand %p758_p0, %p169_p2 }
   0x6   : > { %v902_v0 = vld [vmem:[%s1121_s1] sm:$0xff] (!%p170_p3)   ;;  %s759_s18 = sshll.u32 (!%p170_p3), %s940_s12, 5  ;;  %v903_v1 = vld [vmem:[%s1121_s1 + $0x8] sm:$0xff] (!%p170_p3)   ;;  %v904_v2 = vld [vmem:[%s1121_s1 + $0x10] sm:$0xff] (!%p170_p3)  }
   0x7   : > { %173 = sbr.rel (%p170_p3) target bundleno = 283 (0x11b), region = 32  ;;  %p204_p4 = scmp.lt.s32.totalorder (!%p170_p3), %s759_s18, 63  ;;  %814 = vmatprep.subr.bf16.mxu0 (!%p170_p3), %v902_v0  ;;  %862 = vmatprep.subr.bf16.mxu1 (!%p170_p3), %v902_v0  ;;  %v905_v3 = vld [vmem:[%s1121_s1 + $0x18] sm:$0xff] (!%p170_p3)   ;;  %v906_v6 = vld [vmem:[%s1121_s1 + $0x20] sm:$0xff] (!%p170_p3)   ;;  %v907_v7 = vld [vmem:[%s1121_s1 + $0x28] sm:$0xff] (!%p170_p3)  }
   0x8   : > { %815 = vmatpush3.bf16.msra.mxu0 (!%p170_p3), %v902_v0  ;;  %870 = vmatpush3.bf16.msra.mxu1 (!%p170_p3), %v902_v0  ;;  %v908_v8 = vld [vmem:[%s1121_s1 + $0x30] sm:$0xff] (!%p170_p3)   ;;  %v909_v9 = vld [vmem:[%s1121_s1 + $0x38] sm:$0xff] (!%p170_p3)   ;;  %v1039_v24 = vld [vmem:[%s1122_s2] ss:$0 sm:$0xff] (!%p170_p3) }
   0x9   : > { %816 = vmatprep.subr.bf16.mxu0 (!%p170_p3), %v903_v1  ;;  %863 = vmatprep.subr.bf16.mxu1 (!%p170_p3), %v903_v1 }
   0xc   : > { %817 = vmatpush3.bf16.msra.mxu0 (!%p170_p3), %v903_v1  ;;  %871 = vmatpush3.bf16.msra.mxu1 (!%p170_p3), %v903_v1 }
   0xd   : > { %818 = vmatprep.subr.bf16.mxu0 (!%p170_p3), %v904_v2  ;;  %864 = vmatprep.subr.bf16.mxu1 (!%p170_p3), %v904_v2 }
   0xe   : > { %s1129_s18 = smov (!%p204_p4, %s759_s18), 63 }
   0xf   : > { %s760_s23 = sshll.u32 %s1129_s18, 2  ;;  %s762_s12 = sshll.u32 %s1129_s18, 3 }
  0x10   : > { %s1003_s26 = scalar_lea.vmem %s1120_s0, %s760_s23  ;;  %819 = vmatpush3.bf16.msra.mxu0 %v904_v2  ;;  %872 = vmatpush3.bf16.msra.mxu1 %v904_v2  ;;  %s1047_s19 = scalar_lea.vmem %s1123_s3, %s762_s12 }
  0x11   : > { %v910_v4 = vld [vmem:[%s1003_s26] sm:$0xff]   ;;  %820 = vmatprep.subr.bf16.mxu0 %v905_v3  ;;  %865 = vmatprep.subr.bf16.mxu1 %v905_v3  ;;  %v912_v10 = vld [vmem:[%s1003_s26 + $0x8] sm:$0xff]   ;;  %v914_v12 = vld [vmem:[%s1003_s26 + $0x10] sm:$0xff]  }
  0x12   : > { %v911_v5 = vld [vmem:[%s1003_s26 + $0x40] sm:$0xff]   ;;  %830 = vmatprep.mubr.bf16.mxu0 %v910_v4  ;;  %v913_v11 = vld [vmem:[%s1003_s26 + $0x48] sm:$0xff]   ;;  %v915_v13 = vld [vmem:[%s1003_s26 + $0x50] sm:$0xff]  }
  0x13   : > { %846 = vmatprep.mubr.bf16.mxu1 %v911_v5  ;;  %v916_v14 = vld [vmem:[%s1003_s26 + $0x18] sm:$0xff]   ;;  %v918_v16 = vld [vmem:[%s1003_s26 + $0x20] sm:$0xff]   ;;  %v920_v18 = vld [vmem:[%s1003_s26 + $0x28] sm:$0xff]  }
  0x14   : > { %821 = vmatpush3.bf16.msra.mxu0 %v905_v3  ;;  %873 = vmatpush3.bf16.msra.mxu1 %v905_v3  ;;  %v917_v15 = vld [vmem:[%s1003_s26 + $0x58] sm:$0xff]   ;;  %v919_v17 = vld [vmem:[%s1003_s26 + $0x60] sm:$0xff]   ;;  %v921_v19 = vld [vmem:[%s1003_s26 + $0x68] sm:$0xff]  }
  0x15   : > { %822 = vmatprep.subr.bf16.mxu0 %v906_v6  ;;  %866 = vmatprep.subr.bf16.mxu1 %v906_v6  ;;  %v922_v20 = vld [vmem:[%s1003_s26 + $0x30] sm:$0xff]   ;;  %v924_v22 = vld [vmem:[%s1003_s26 + $0x38] sm:$0xff]  }
  0x16   : > { %v923_v21 = vld [vmem:[%s1003_s26 + $0x70] sm:$0xff]   ;;  %v925_v23 = vld [vmem:[%s1003_s26 + $0x78] sm:$0xff]  }
  0x18   : > { %823 = vmatpush3.bf16.msra.mxu0 %v906_v6  ;;  %874 = vmatpush3.bf16.msra.mxu1 %v906_v6 }
  0x19   : > { %824 = vmatprep.subr.bf16.mxu0 %v907_v7  ;;  %867 = vmatprep.subr.bf16.mxu1 %v907_v7 }
  0x1c   : > { %825 = vmatpush3.bf16.msra.mxu0 %v907_v7  ;;  %875 = vmatpush3.bf16.msra.mxu1 %v907_v7 }
  0x1d   : > { %826 = vmatprep.subr.bf16.mxu0 %v908_v8  ;;  %868 = vmatprep.subr.bf16.mxu1 %v908_v8 }
  0x20   : > { %827 = vmatpush3.bf16.msra.mxu0 %v908_v8  ;;  %876 = vmatpush3.bf16.msra.mxu1 %v908_v8 }
  0x21   : > { %828 = vmatprep.subr.bf16.mxu0 %v909_v9  ;;  %869 = vmatprep.subr.bf16.mxu1 %v909_v9 }
  0x24   : > { %829 = vmatpush3.bf16.msra.mxu0 %v909_v9  ;;  %877 = vmatpush3.bf16.msra.mxu1 %v909_v9 }
  0x27   : > { %831 = vmatmul.mubr.bf16.vlgmr.msra.gmra.mrb[0].mxu0 %v912_v10  ;;  %847 = vmatmul.mubr.bf16.vlgmr.msra.gmra.mrb[0].mxu1 %v913_v11 }
  0x28   : > { %834 = vmatprep.mubr.bf16.mxu0 %v914_v12  ;;  %850 = vmatprep.mubr.bf16.mxu1 %v915_v13 }
  0x2f   : > { %835 = vmatmul.mubr.bf16.gmra.mrb[4].mxu0 %v916_v14  ;;  %851 = vmatmul.mubr.bf16.gmra.mrb[4].mxu1 %v917_v15 }
  0x30   : > { %838 = vmatprep.mubr.bf16.mxu0 %v918_v16  ;;  %854 = vmatprep.mubr.bf16.mxu1 %v919_v17 }
  0x37   : > { %839 = vmatmul.mubr.bf16.gmra.mrb[8].mxu0 %v920_v18  ;;  %855 = vmatmul.mubr.bf16.gmra.mrb[8].mxu1 %v921_v19 }
  0x38   : > { %842 = vmatprep.mubr.bf16.mxu0 %v922_v20  ;;  %858 = vmatprep.mubr.bf16.mxu1 %v923_v21 }
  0x3f   : > { %843 = vmatmul.mubr.bf16.gmra.mrb[12].mxu0 %v924_v22  ;;  %859 = vmatmul.mubr.bf16.gmra.mrb[12].mxu1 %v925_v23 }
  0xfa   : > { %v832_v25 = vpop.f32.mrb[0].mxu0  ;;  %v848_v26 = vpop.f32.mrb[0].mxu1 }
  0xfb   : > { %v468_v27 = vadd.f32 %v832_v25, %v1039_v24  ;;  %v532_v28 = vadd.f32 %v848_v26, %v1039_v24  ;;  %v459_v29 = vpop.f32.mrb[1].mxu0  ;;  %v523_v30 = vpop.f32.mrb[1].mxu1 }
  0xfc   : > { %v460_v31 = vadd.f32 %v1039_v24, %v459_v29  ;;  %v524_v32 = vadd.f32 %v1039_v24, %v523_v30  ;;  %v833_v33 = vpop.f32.mrb[2].mxu0  ;;  %v849_v34 = vpop.f32.mrb[2].mxu1 }
  0xfd   : > { %v588_v35 = vmax.f32 %v468_v27, 0.0  ;;  %v604_v36 = vmax.f32 %v532_v28, 0.0  ;;  %v471_v37 = vadd.f32 %v833_v33, %v1039_v24  ;;  %v535_v38 = vadd.f32 %v849_v34, %v1039_v24  ;;  %v462_v39 = vpop.f32.mrb[3].mxu0  ;;  %v526_v40 = vpop.f32.mrb[3].mxu1 }
  0xfe   : > { %v586_v41 = vmax.f32 %v460_v31, 0.0  ;;  %v602_v42 = vmax.f32 %v524_v32, 0.0  ;;  %v463_v43 = vadd.f32 %v1039_v24, %v462_v39  ;;  %v527_v44 = vadd.f32 %v1039_v24, %v526_v40 }
  0xff   : > { %620 = vst [vmem:[%s1047_s19 + $0x10] sm:$0xff] %v588_v35  ;;  %636 = vst [vmem:[%s1047_s19 + $0x90] sm:$0xff] %v604_v36  ;;  %v589_v45 = vmax.f32 %v471_v37, 0.0  ;;  %v605_v46 = vmax.f32 %v535_v38, 0.0 }
 0x100   : > { %618 = vst [vmem:[%s1047_s19] sm:$0xff] %v586_v41  ;;  %634 = vst [vmem:[%s1047_s19 + $0x80] sm:$0xff] %v602_v42  ;;  %v587_v47 = vmax.f32 %v463_v43, 0.0  ;;  %v603_v48 = vmax.f32 %v527_v44, 0.0 }
 0x101   : > { %621 = vst [vmem:[%s1047_s19 + $0x18] sm:$0xff] %v589_v45  ;;  %637 = vst [vmem:[%s1047_s19 + $0x98] sm:$0xff] %v605_v46 }
 0x102   : > { %619 = vst [vmem:[%s1047_s19 + $0x8] sm:$0xff] %v587_v47  ;;  %635 = vst [vmem:[%s1047_s19 + $0x88] sm:$0xff] %v603_v48  ;;  %v836_v49 = vpop.f32.mrb[4].mxu0  ;;  %v852_v50 = vpop.f32.mrb[4].mxu1 }
 0x103   : > { %v484_v51 = vadd.f32 %v836_v49, %v1039_v24  ;;  %v548_v52 = vadd.f32 %v852_v50, %v1039_v24  ;;  %v475_v53 = vpop.f32.mrb[5].mxu0  ;;  %v539_v54 = vpop.f32.mrb[5].mxu1 }
 0x104   : > { %v476_v55 = vadd.f32 %v1039_v24, %v475_v53  ;;  %v540_v56 = vadd.f32 %v1039_v24, %v539_v54  ;;  %v837_v57 = vpop.f32.mrb[6].mxu0  ;;  %v853_v58 = vpop.f32.mrb[6].mxu1 }
 0x105   : > { %v592_v59 = vmax.f32 %v484_v51, 0.0  ;;  %v608_v60 = vmax.f32 %v548_v52, 0.0  ;;  %v487_v61 = vadd.f32 %v837_v57, %v1039_v24  ;;  %v551_v62 = vadd.f32 %v853_v58, %v1039_v24  ;;  %v478_v63 = vpop.f32.mrb[7].mxu0  ;;  %v542_v0 = vpop.f32.mrb[7].mxu1 }
 0x106   : > { %v590_v1 = vmax.f32 %v476_v55, 0.0  ;;  %v606_v2 = vmax.f32 %v540_v56, 0.0  ;;  %v479_v3 = vadd.f32 %v1039_v24, %v478_v63  ;;  %v543_v4 = vadd.f32 %v1039_v24, %v542_v0 }
 0x107   : > { %624 = vst [vmem:[%s1047_s19 + $0x30] sm:$0xff] %v592_v59  ;;  %640 = vst [vmem:[%s1047_s19 + $0xb0] sm:$0xff] %v608_v60  ;;  %v593_v5 = vmax.f32 %v487_v61, 0.0  ;;  %v609_v6 = vmax.f32 %v551_v62, 0.0 }
 0x108   : > { %622 = vst [vmem:[%s1047_s19 + $0x20] sm:$0xff] %v590_v1  ;;  %638 = vst [vmem:[%s1047_s19 + $0xa0] sm:$0xff] %v606_v2  ;;  %v591_v7 = vmax.f32 %v479_v3, 0.0  ;;  %v607_v8 = vmax.f32 %v543_v4, 0.0 }
 0x109   : > { %625 = vst [vmem:[%s1047_s19 + $0x38] sm:$0xff] %v593_v5  ;;  %641 = vst [vmem:[%s1047_s19 + $0xb8] sm:$0xff] %v609_v6 }
 0x10a   : > { %623 = vst [vmem:[%s1047_s19 + $0x28] sm:$0xff] %v591_v7  ;;  %639 = vst [vmem:[%s1047_s19 + $0xa8] sm:$0xff] %v607_v8  ;;  %v840_v9 = vpop.f32.mrb[8].mxu0  ;;  %v856_v10 = vpop.f32.mrb[8].mxu1 }
 0x10b   : > { %v500_v11 = vadd.f32 %v840_v9, %v1039_v24  ;;  %v564_v12 = vadd.f32 %v856_v10, %v1039_v24  ;;  %v491_v13 = vpop.f32.mrb[9].mxu0  ;;  %v555_v14 = vpop.f32.mrb[9].mxu1 }
 0x10c   : > { %v492_v15 = vadd.f32 %v1039_v24, %v491_v13  ;;  %v556_v16 = vadd.f32 %v1039_v24, %v555_v14  ;;  %v841_v17 = vpop.f32.mrb[10].mxu0  ;;  %v857_v18 = vpop.f32.mrb[10].mxu1 }
 0x10d   : > { %v596_v19 = vmax.f32 %v500_v11, 0.0  ;;  %v612_v20 = vmax.f32 %v564_v12, 0.0  ;;  %v503_v21 = vadd.f32 %v841_v17, %v1039_v24  ;;  %v567_v22 = vadd.f32 %v857_v18, %v1039_v24  ;;  %v494_v23 = vpop.f32.mrb[11].mxu0  ;;  %v558_v25 = vpop.f32.mrb[11].mxu1 }
 0x10e   : > { %v594_v26 = vmax.f32 %v492_v15, 0.0  ;;  %v610_v27 = vmax.f32 %v556_v16, 0.0  ;;  %v495_v28 = vadd.f32 %v1039_v24, %v494_v23  ;;  %v559_v29 = vadd.f32 %v1039_v24, %v558_v25 }
 0x10f   : > { %628 = vst [vmem:[%s1047_s19 + $0x50] sm:$0xff] %v596_v19  ;;  %644 = vst [vmem:[%s1047_s19 + $0xd0] sm:$0xff] %v612_v20  ;;  %v597_v30 = vmax.f32 %v503_v21, 0.0  ;;  %v613_v31 = vmax.f32 %v567_v22, 0.0 }
 0x110   : > { %626 = vst [vmem:[%s1047_s19 + $0x40] sm:$0xff] %v594_v26  ;;  %642 = vst [vmem:[%s1047_s19 + $0xc0] sm:$0xff] %v610_v27  ;;  %v595_v32 = vmax.f32 %v495_v28, 0.0  ;;  %v611_v33 = vmax.f32 %v559_v29, 0.0 }
 0x111   : > { %629 = vst [vmem:[%s1047_s19 + $0x58] sm:$0xff] %v597_v30  ;;  %645 = vst [vmem:[%s1047_s19 + $0xd8] sm:$0xff] %v613_v31 }
 0x112   : > { %627 = vst [vmem:[%s1047_s19 + $0x48] sm:$0xff] %v595_v32  ;;  %643 = vst [vmem:[%s1047_s19 + $0xc8] sm:$0xff] %v611_v33  ;;  %v844_v34 = vpop.f32.mrb[12].mxu0  ;;  %v860_v35 = vpop.f32.mrb[12].mxu1 }
 0x113   : > { %v516_v36 = vadd.f32 %v844_v34, %v1039_v24  ;;  %v580_v37 = vadd.f32 %v860_v35, %v1039_v24  ;;  %v507_v38 = vpop.f32.mrb[13].mxu0  ;;  %v571_v39 = vpop.f32.mrb[13].mxu1 }
 0x114   : > { %v508_v40 = vadd.f32 %v1039_v24, %v507_v38  ;;  %v572_v41 = vadd.f32 %v1039_v24, %v571_v39  ;;  %v845_v42 = vpop.f32.mrb[14].mxu0  ;;  %v861_v43 = vpop.f32.mrb[14].mxu1 }
 0x115   : > { %v600_v44 = vmax.f32 %v516_v36, 0.0  ;;  %v616_v45 = vmax.f32 %v580_v37, 0.0  ;;  %v519_v46 = vadd.f32 %v845_v42, %v1039_v24  ;;  %v583_v47 = vadd.f32 %v861_v43, %v1039_v24  ;;  %v510_v48 = vpop.f32.mrb[15].mxu0  ;;  %v574_v49 = vpop.f32.mrb[15].mxu1 }
 0x116   : > { %v598_v50 = vmax.f32 %v508_v40, 0.0  ;;  %v614_v51 = vmax.f32 %v572_v41, 0.0  ;;  %v511_v52 = vadd.f32 %v1039_v24, %v510_v48  ;;  %v575_v53 = vadd.f32 %v1039_v24, %v574_v49 }
 0x117   : > { %632 = vst [vmem:[%s1047_s19 + $0x70] sm:$0xff] %v600_v44  ;;  %648 = vst [vmem:[%s1047_s19 + $0xf0] sm:$0xff] %v616_v45  ;;  %v601_v54 = vmax.f32 %v519_v46, 0.0  ;;  %v617_v55 = vmax.f32 %v583_v47, 0.0 }
 0x118   : > { %630 = vst [vmem:[%s1047_s19 + $0x60] sm:$0xff] %v598_v50  ;;  %646 = vst [vmem:[%s1047_s19 + $0xe0] sm:$0xff] %v614_v51  ;;  %v599_v56 = vmax.f32 %v511_v52, 0.0  ;;  %v615_v57 = vmax.f32 %v575_v53, 0.0 }
 0x119   : > { %633 = vst [vmem:[%s1047_s19 + $0x78] sm:$0xff] %v601_v54  ;;  %649 = vst [vmem:[%s1047_s19 + $0xf8] sm:$0xff] %v617_v55 }
 0x11a   : > { %631 = vst [vmem:[%s1047_s19 + $0x68] sm:$0xff] %v599_v56  ;;  %647 = vst [vmem:[%s1047_s19 + $0xe8] sm:$0xff] %v615_v57 }
 0x11b PF: > { %s13_s14 = sadd.s32 1, %s948_s14   ;;  %s1124_s12 = smov %s944_s13 }
 0x11c   : > { %p10_p5 = scmp.ge.s32.totalorder %s13_s14, 4   ;;  %s1125_s13 = smov %s1127_s15 }
 0x11e   :  { %12 = sbr.rel (!%p10_p5) target bundleno = 2 (0x2), region = 68 }

// kernel: inception_red_forward.9
= control target key start
LH: loop header
LB: loop body
LE: loop exit
PB: predicated region body
PF: predicated region fallthrough
CT: control target
= control target key end

     0   :  { %s917_s12 = smov 0   ;;  %s919_s13 = smov 0   ;;  %s1083_s0 = inlined_call_operand.vmem [shape: bf16[112,128], index: 0, kind: input, shape index: {}]   ;;  %s1084_s1 = inlined_call_operand.vmem [shape: bf16[128,384], index: 1, kind: input, shape index: {}]   ;;  %s1085_s2 = inlined_call_operand.vmem [shape: f32[1,384], index: 2, kind: input, shape index: {}]   ;;  %s1086_s3 = inlined_call_operand.vmem [shape: f32[112,384], index: 3, kind: output, shape index: {}]  }
   0x1   :  { %s921_s14 = smov 0  }
   0x2 LB: > { %s25_s15 = sadd.s32 1, %s890_s13  ;;  %p741_p0 = scmp.ge.s32.totalorder %s894_s14, 1  ;;  %s894_s14 = sphi %s921_s14, %s13_s14   ;;  %s890_s13 = sphi %s919_s13, %s1088_s13   ;;  %s886_s12 = sphi %s917_s12, %s1087_s12  }
   0x3   : > { %p27_p1 = scmp.ge.s32.totalorder %s25_s15, 2  ;;  %p173_p2 = scmp.lt.s32.totalorder %s894_s14, 3 }
   0x5   : > { %s1090_s15 = smov (%p27_p1, %s25_s15), 0  ;;  %p174_p3 = pnand %p741_p0, %p173_p2 }
   0x6   : > { %v836_v0 = vld [vmem:[%s1084_s1 + $0x4] ss:$12 sps:$4 sm:$0xff] (!%p174_p3)   ;;  %s211_s18 = smul.u32 (!%p174_p3), 7, %s886_s12  ;;  %v838_v1 = vld [vmem:[%s1084_s1] ss:$12 sps:$4 sm:$0xff] (!%p174_p3)   ;;  %v896_v2 = vmov (!%p174_p3), 0   ;;  %v282_v29 = vlaneseq (!%p174_p3) }
   0x7   : > { %177 = sbr.rel (%p174_p3) target bundleno = 281 (0x119), region = 32  ;;  %479 = vmatprep.mubr.bf16.mxu0 (!%p174_p3), %v896_v2  ;;  %447 = vmatprep.subr.bf16.mxu0 (!%p174_p3), %v836_v0  ;;  %v839_v3 = vld [vmem:[%s1084_s1 + $0x1c] ss:$12 sps:$4 sm:$0xff] (!%p174_p3)   ;;  %v841_v4 = vld [vmem:[%s1084_s1 + $0x18] ss:$12 sps:$4 sm:$0xff] (!%p174_p3)  }
   0x8   : > { %448 = vmatpush1.bf16.msra.mxu0 (!%p174_p3), %v838_v1  ;;  %v842_v5 = vld [vmem:[%s1084_s1 + $0x34] ss:$12 sps:$4 sm:$0xff] (!%p174_p3)   ;;  %p212_p4 = scmp.lt.s32.totalorder (!%p174_p3), %s211_s18, 13  ;;  %v844_v7 = vld [vmem:[%s1084_s1 + $0x30] ss:$12 sps:$4 sm:$0xff] (!%p174_p3)   ;;  %v283_v30 = vshrl.u32 (!%p174_p3), %v282_v29, 7 }
   0x9   : > { %449 = vmatprep.subr.bf16.mxu0 (!%p174_p3), %v839_v3  ;;  %v845_v6 = vld [vmem:[%s1084_s1 + $0x8] ss:$12 sps:$4 sm:$0xff] (!%p174_p3)   ;;  %v849_v8 = vld [vmem:[%s1084_s1 + $0x20] ss:$12 sps:$4 sm:$0xff] (!%p174_p3)   ;;  %v853_v10 = vld [vmem:[%s1084_s1 + $0x38] ss:$12 sps:$4 sm:$0xff] (!%p174_p3)  }
   0xa   : > { %786 = vmatprep.subr.bf16.mxu1 (!%p174_p3), %v845_v6  ;;  %v846_v9 = vld [vmem:[%s1084_s1 + $0x4c] ss:$12 sps:$4 sm:$0xff] (!%p174_p3)   ;;  %v848_v11 = vld [vmem:[%s1084_s1 + $0x48] ss:$12 sps:$4 sm:$0xff] (!%p174_p3)   ;;  %v850_v12 = vld [vmem:[%s1084_s1 + $0x64] ss:$12 sps:$4 sm:$0xff] (!%p174_p3)  }
   0xb   : > { %787 = vmatpush3.bf16.msra.mxu1 (!%p174_p3), %v845_v6  ;;  %v857_v13 = vld [vmem:[%s1084_s1 + $0x50] ss:$12 sps:$4 sm:$0xff] (!%p174_p3)   ;;  %v852_v14 = vld [vmem:[%s1084_s1 + $0x60] ss:$12 sps:$4 sm:$0xff] (!%p174_p3)   ;;  %v861_v16 = vld [vmem:[%s1084_s1 + $0x68] ss:$12 sps:$4 sm:$0xff] (!%p174_p3)  }
   0xc   : > { %450 = vmatpush1.bf16.msra.mxu0 (!%p174_p3), %v841_v4  ;;  %788 = vmatprep.subr.bf16.mxu1 (!%p174_p3), %v849_v8  ;;  %v854_v15 = vld [vmem:[%s1084_s1 + $0x7c] ss:$12 sps:$4 sm:$0xff] (!%p174_p3)   ;;  %v856_v17 = vld [vmem:[%s1084_s1 + $0x78] ss:$12 sps:$4 sm:$0xff] (!%p174_p3)   ;;  %v858_v18 = vld [vmem:[%s1084_s1 + $0x94] ss:$12 sps:$4 sm:$0xff] (!%p174_p3)  }
   0xd   : > { %451 = vmatprep.subr.bf16.mxu0 (!%p174_p3), %v842_v5  ;;  %v865_v20 = vld [vmem:[%s1084_s1 + $0x80] ss:$12 sps:$4 sm:$0xff] (!%p174_p3)   ;;  %v860_v21 = vld [vmem:[%s1084_s1 + $0x90] ss:$12 sps:$4 sm:$0xff] (!%p174_p3)   ;;  %v867_v23 = vld [vmem:[%s1084_s1 + $0x98] ss:$12 sps:$4 sm:$0xff] (!%p174_p3)  }
   0xe   : > { %s1092_s18 = smov (!%p212_p4, %s211_s18), 13  ;;  %v862_v22 = vld [vmem:[%s1084_s1 + $0xac] ss:$12 sps:$4 sm:$0xff]   ;;  %v864_v24 = vld [vmem:[%s1084_s1 + $0xa8] ss:$12 sps:$4 sm:$0xff]   ;;  %v284_v31 = vsub.s32 0, %v283_v30 }
   0xf   : > { %789 = vmatpush3.bf16.msra.mxu1 %v849_v8  ;;  %s742_s20 = sshll.u32 %s1092_s18, 2  ;;  %v868_v25 = vld [vmem:[%s1084_s1 + $0xb0] ss:$12 sps:$4 sm:$0xff]   ;;  %v280_v32 = vld [vmem:[%s1085_s2] sm:$0x7]  ;;  %v288_v33 = vsub.s32 1, %v283_v30 }
  0x10   : > { %452 = vmatpush1.bf16.msra.mxu0 %v844_v7  ;;  %790 = vmatprep.subr.bf16.mxu1 %v853_v10  ;;  %s990_s27 = scalar_lea.vmem %s1083_s0, %s742_s20  ;;  %v1029_v34 = vrot.slane %v280_v32, %v284_v31  ;;  %v292_v35 = vsub.s32 2, %v283_v30  ;;  %s810_s25 = smul.u32 24, %s1092_s18 }
  0x11   : > { %453 = vmatprep.subr.bf16.mxu0 %v846_v9  ;;  %v866_v19 = vld [vmem:[%s990_s27] sm:$0xff]   ;;  %v869_v26 = vld [vmem:[%s990_s27 + $0x8] sm:$0xff]   ;;  %v870_v27 = vld [vmem:[%s990_s27 + $0x10] sm:$0xff]   ;;  %v1032_v36 = vrot.slane %v280_v32, %v288_v33 }
  0x12   : > { %802 = vmatprep.mubr.bf16.mxu1 %v866_v19  ;;  %v871_v28 = vld [vmem:[%s990_s27 + $0x18] ss:$0 sps:$4 sm:$0xff]   ;;  %v293_v40 = vrot.slane %v280_v32, %v292_v35  ;;  %s1038_s28 = scalar_lea.vmem %s1086_s3, %s810_s25 }
  0x13   : > { %791 = vmatpush3.bf16.msra.mxu1 %v853_v10 }
  0x14   : > { %454 = vmatpush1.bf16.msra.mxu0 %v848_v11  ;;  %792 = vmatprep.subr.bf16.mxu1 %v857_v13 }
  0x15   : > { %455 = vmatprep.subr.bf16.mxu0 %v850_v12 }
  0x17   : > { %793 = vmatpush3.bf16.msra.mxu1 %v857_v13 }
  0x18   : > { %456 = vmatpush1.bf16.msra.mxu0 %v852_v14  ;;  %794 = vmatprep.subr.bf16.mxu1 %v861_v16 }
  0x19   : > { %457 = vmatprep.subr.bf16.mxu0 %v854_v15 }
  0x1b   : > { %795 = vmatpush3.bf16.msra.mxu1 %v861_v16 }
  0x1c   : > { %458 = vmatpush1.bf16.msra.mxu0 %v856_v17  ;;  %796 = vmatprep.subr.bf16.mxu1 %v865_v20 }
  0x1d   : > { %459 = vmatprep.subr.bf16.mxu0 %v858_v18 }
  0x1f   : > { %797 = vmatpush3.bf16.msra.mxu1 %v865_v20 }
  0x20   : > { %460 = vmatpush1.bf16.msra.mxu0 %v860_v21  ;;  %798 = vmatprep.subr.bf16.mxu1 %v867_v23 }
  0x21   : > { %461 = vmatprep.subr.bf16.mxu0 %v862_v22 }
  0x23   : > { %799 = vmatpush3.bf16.msra.mxu1 %v867_v23 }
  0x24   : > { %462 = vmatpush1.bf16.msra.mxu0 %v864_v24  ;;  %800 = vmatprep.subr.bf16.mxu1 %v868_v25 }
  0x27   : > { %480 = vmatmul.mubr.bf16.vlgmr.msra.gmra.mrb[0].mxu0 %v866_v19  ;;  %801 = vmatpush3.bf16.msra.mxu1 %v868_v25 }
  0x28   : > { %489 = vmatprep.mubr.bf16.mxu0 %v896_v2 }
  0x2a   : > { %803 = vmatmul.mubr.bf16.vlgmr.msra.gmra.mrb[0].mxu1 %v869_v26 }
  0x2b   : > { %806 = vmatprep.mubr.bf16.mxu1 %v870_v27 }
  0x2f   : > { %490 = vmatmul.mubr.bf16.gmra.mrb[4].mxu0 %v869_v26 }
  0x30   : > { %499 = vmatprep.mubr.bf16.mxu0 %v896_v2 }
  0x32   : > { %807 = vmatmul.mubr.bf16.gmra.mrb[4].mxu1 %v871_v28 }
  0x37   : > { %500 = vmatmul.mubr.bf16.gmra.mrb[8].mxu0 %v870_v27 }
  0x38   : > { %509 = vmatprep.mubr.bf16.mxu0 %v896_v2 }
  0x3f   : > { %510 = vmatmul.mubr.bf16.gmra.mrb[12].mxu0 %v871_v28 }
  0xfa   : > { %v481_v37 = vpop.f32.mrb[0].mxu0 }
  0xfb   : > { %v482_v38 = vadd.f32 %v481_v37, %v1029_v34  ;;  %v483_v39 = vpop.f32.mrb[1].mxu0 }
  0xfc   : > { %v484_v41 = vadd.f32 %v483_v39, %v1032_v36  ;;  %v485_v42 = vpop.f32.mrb[2].mxu0 }
  0xfd   : > { %v582_v43 = vmax.f32 %v482_v38, 0.0  ;;  %v486_v44 = vadd.f32 %v485_v42, %v1029_v34  ;;  %v487_v45 = vpop.f32.mrb[3].mxu0  ;;  %v804_v48 = vpop.f32.mrb[0].mxu1 }
  0xfe   : > { %v583_v46 = vmax.f32 %v484_v41, 0.0  ;;  %v488_v47 = vadd.f32 %v487_v45, %v1032_v36  ;;  %v561_v50 = vadd.f32 %v804_v48, %v293_v40  ;;  %v552_v51 = vpop.f32.mrb[1].mxu1 }
  0xff   : > { %603 = vst [vmem:[%s1038_s28] sm:$0xff] %v582_v43  ;;  %v585_v49 = vmax.f32 %v486_v44, 0.0  ;;  %v553_v53 = vadd.f32 %v552_v51, %v293_v40  ;;  %v805_v54 = vpop.f32.mrb[2].mxu1 }
 0x100   : > { %604 = vst [vmem:[%s1038_s28 + $0x8] sm:$0xff] %v583_v46  ;;  %v586_v52 = vmax.f32 %v488_v47, 0.0  ;;  %v590_v55 = vmax.f32 %v561_v50, 0.0  ;;  %v564_v56 = vadd.f32 %v805_v54, %v293_v40  ;;  %v555_v57 = vpop.f32.mrb[3].mxu1 }
 0x101   : > { %606 = vst [vmem:[%s1038_s28 + $0x18] sm:$0xff] %v585_v49  ;;  %v584_v59 = vmax.f32 %v553_v53, 0.0  ;;  %v556_v60 = vadd.f32 %v555_v57, %v293_v40 }
 0x102   : > { %607 = vst [vmem:[%s1038_s28 + $0x20] sm:$0xff] %v586_v52  ;;  %v491_v58 = vpop.f32.mrb[4].mxu0  ;;  %611 = vst [vmem:[%s1038_s28 + $0x40] sm:$0xff] %v590_v55  ;;  %v593_v63 = vmax.f32 %v564_v56, 0.0 }
 0x103   : > { %v492_v61 = vadd.f32 %v491_v58, %v1029_v34  ;;  %v493_v62 = vpop.f32.mrb[5].mxu0  ;;  %605 = vst [vmem:[%s1038_s28 + $0x10] sm:$0xff] %v584_v59  ;;  %v587_v2 = vmax.f32 %v556_v60, 0.0 }
 0x104   : > { %v494_v0 = vadd.f32 %v493_v62, %v1032_v36  ;;  %v495_v1 = vpop.f32.mrb[6].mxu0  ;;  %614 = vst [vmem:[%s1038_s28 + $0x58] sm:$0xff] %v593_v63 }
 0x105   : > { %v588_v3 = vmax.f32 %v492_v61, 0.0  ;;  %v496_v4 = vadd.f32 %v495_v1, %v1029_v34  ;;  %v497_v5 = vpop.f32.mrb[7].mxu0  ;;  %608 = vst [vmem:[%s1038_s28 + $0x28] sm:$0xff] %v587_v2  ;;  %v808_v8 = vpop.f32.mrb[4].mxu1 }
 0x106   : > { %v589_v6 = vmax.f32 %v494_v0, 0.0  ;;  %v498_v7 = vadd.f32 %v497_v5, %v1032_v36  ;;  %v577_v10 = vadd.f32 %v808_v8, %v293_v40  ;;  %v568_v11 = vpop.f32.mrb[5].mxu1 }
 0x107   : > { %609 = vst [vmem:[%s1038_s28 + $0x30] sm:$0xff] %v588_v3  ;;  %v591_v9 = vmax.f32 %v496_v4, 0.0  ;;  %v569_v13 = vadd.f32 %v568_v11, %v293_v40  ;;  %v809_v14 = vpop.f32.mrb[6].mxu1 }
 0x108   : > { %610 = vst [vmem:[%s1038_s28 + $0x38] sm:$0xff] %v589_v6  ;;  %v592_v12 = vmax.f32 %v498_v7, 0.0  ;;  %v602_v15 = vmax.f32 %v577_v10, 0.0  ;;  %v571_v16 = vpop.f32.mrb[7].mxu1 }
 0x109   : > { %612 = vst [vmem:[%s1038_s28 + $0x48] sm:$0xff] %v591_v9  ;;  %v596_v18 = vmax.f32 %v569_v13, 0.0  ;;  %v572_v19 = vadd.f32 %v571_v16, %v293_v40 }
 0x10a   : > { %613 = vst [vmem:[%s1038_s28 + $0x50] sm:$0xff] %v592_v12  ;;  %v501_v17 = vpop.f32.mrb[8].mxu0  ;;  %623 = vst [vmem:[%s1038_s28 + $0xa0] sm:$0xff] %v602_v15 }
 0x10b   : > { %v502_v20 = vadd.f32 %v501_v17, %v1029_v34  ;;  %v503_v21 = vpop.f32.mrb[9].mxu0  ;;  %617 = vst [vmem:[%s1038_s28 + $0x70] sm:$0xff] %v596_v18  ;;  %v599_v24 = vmax.f32 %v572_v19, 0.0 }
 0x10c   : > { %v504_v22 = vadd.f32 %v503_v21, %v1032_v36  ;;  %v505_v23 = vpop.f32.mrb[10].mxu0 }
 0x10d   : > { %v594_v25 = vmax.f32 %v502_v20, 0.0  ;;  %v506_v26 = vadd.f32 %v505_v23, %v1029_v34  ;;  %v507_v27 = vpop.f32.mrb[11].mxu0  ;;  %620 = vst [vmem:[%s1038_s28 + $0x88] sm:$0xff] %v599_v24 }
 0x10e   : > { %v595_v28 = vmax.f32 %v504_v22, 0.0  ;;  %v508_v29 = vadd.f32 %v507_v27, %v1032_v36 }
 0x10f   : > { %615 = vst [vmem:[%s1038_s28 + $0x60] sm:$0xff] %v594_v25  ;;  %v597_v30 = vmax.f32 %v506_v26, 0.0 }
 0x110   : > { %616 = vst [vmem:[%s1038_s28 + $0x68] sm:$0xff] %v595_v28  ;;  %v598_v31 = vmax.f32 %v508_v29, 0.0 }
 0x111   : > { %618 = vst [vmem:[%s1038_s28 + $0x78] sm:$0xff] %v597_v30 }
 0x112   : > { %619 = vst [vmem:[%s1038_s28 + $0x80] sm:$0xff] %v598_v31  ;;  %v511_v32 = vpop.f32.mrb[12].mxu0 }
 0x113   : > { %v512_v33 = vadd.f32 %v511_v32, %v1029_v34  ;;  %v513_v35 = vpop.f32.mrb[13].mxu0 }
 0x114   : > { %v514_v37 = vadd.f32 %v513_v35, %v1032_v36  ;;  %v515_v38 = vpop.f32.mrb[14].mxu0 }
 0x115   : > { %v600_v39 = vmax.f32 %v512_v33, 0.0  ;;  %v516_v40 = vpop.f32.mrb[15].mxu0 }
 0x116   : > { %v601_v41 = vmax.f32 %v514_v37, 0.0 }
 0x117   : > { %621 = vst [vmem:[%s1038_s28 + $0x90] sm:$0xff] %v600_v39 }
 0x118   : > { %622 = vst [vmem:[%s1038_s28 + $0x98] sm:$0xff] %v601_v41 }
 0x119 PF: > { %s13_s14 = sadd.s32 1, %s894_s14   ;;  %s1087_s12 = smov %s890_s13 }
 0x11a   : > { %p10_p5 = scmp.ge.s32.totalorder %s13_s14, 4   ;;  %s1088_s13 = smov %s1090_s15 }
 0x11c   :  { %12 = sbr.rel (!%p10_p5) target bundleno = 2 (0x2), region = 68 }

// kernel: inception_red_forward.6
= control target key start
LH: loop header
LB: loop body
LE: loop exit
PB: predicated region body
PF: predicated region fallthrough
CT: control target
= control target key end

     0   :  { %s1082_s12 = smov 0   ;;  %s1084_s13 = smov 0   ;;  %s1338_s0 = inlined_call_operand.vmem [shape: bf16[512,128], index: 0, kind: input, shape index: {}]   ;;  %s1339_s1 = inlined_call_operand.vmem [shape: bf16[128,256], index: 1, kind: input, shape index: {}]   ;;  %s1340_s2 = inlined_call_operand.vmem [shape: f32[1,256], index: 2, kind: input, shape index: {}]   ;;  %s1341_s3 = inlined_call_operand.vmem [shape: f32[512,256], index: 3, kind: output, shape index: {}]  }
   0x1   :  { %s1086_s14 = smov 0  }
   0x2 LB: > { %s25_s15 = sadd.s32 1, %s1055_s13  ;;  %p915_p0 = scmp.ge.s32.totalorder %s1059_s14, 1  ;;  %s1059_s14 = sphi %s1086_s14, %s13_s14   ;;  %s1055_s13 = sphi %s1084_s13, %s1343_s13   ;;  %s1051_s12 = sphi %s1082_s12, %s1342_s12  }
   0x3   : > { %p27_p1 = scmp.ge.s32.totalorder %s25_s15, 2  ;;  %p173_p2 = scmp.lt.s32.totalorder %s1059_s14, 3 }
   0x5   : > { %s1345_s15 = smov (%p27_p1, %s25_s15), 0  ;;  %p174_p3 = pnand %p915_p0, %p173_p2 }
   0x6   : > { %v997_v0 = vld [vmem:[%s1339_s1 + $0x4] ss:$8 sps:$4 sm:$0xff] (!%p174_p3)   ;;  %s916_s18 = sshll.u32 (!%p174_p3), %s1051_s12, 5  ;;  %v999_v1 = vld [vmem:[%s1339_s1] ss:$8 sps:$4 sm:$0xff] (!%p174_p3)   ;;  %v1061_v2 = vmov (!%p174_p3), 0   ;;  %v291_v33 = vlaneseq (!%p174_p3) }
   0x7   : > { %177 = sbr.rel (%p174_p3) target bundleno = 316 (0x13c), region = 32  ;;  %509 = vmatprep.mubr.bf16.mxu0 (!%p174_p3), %v1061_v2  ;;  %589 = vmatprep.mubr.bf16.mxu1 (!%p174_p3), %v1061_v2  ;;  %p212_p4 = scmp.lt.s32.totalorder (!%p174_p3), %s916_s18, 63  ;;  %v1000_v3 = vld [vmem:[%s1339_s1 + $0x14] ss:$8 sps:$4 sm:$0xff] (!%p174_p3)   ;;  %v1002_v4 = vld [vmem:[%s1339_s1 + $0x10] ss:$8 sps:$4 sm:$0xff] (!%p174_p3)  }
   0x8   : > { %477 = vmatprep.subr.bf16.mxu0 (!%p174_p3), %v997_v0  ;;  %956 = vmatprep.subr.bf16.mxu1 (!%p174_p3), %v997_v0  ;;  %v1003_v5 = vld [vmem:[%s1339_s1 + $0x24] ss:$8 sps:$4 sm:$0xff] (!%p174_p3)   ;;  %v1005_v6 = vld [vmem:[%s1339_s1 + $0x20] ss:$8 sps:$4 sm:$0xff] (!%p174_p3)   ;;  %v1006_v7 = vld [vmem:[%s1339_s1 + $0x34] ss:$8 sps:$4 sm:$0xff] (!%p174_p3)  }
   0x9   : > { %478 = vmatpush1.bf16.msra.mxu0 (!%p174_p3), %v999_v1  ;;  %964 = vmatpush1.bf16.msra.mxu1 (!%p174_p3), %v999_v1  ;;  %v1008_v8 = vld [vmem:[%s1339_s1 + $0x30] ss:$8 sps:$4 sm:$0xff] (!%p174_p3)   ;;  %v1009_v9 = vld [vmem:[%s1339_s1 + $0x44] ss:$8 sps:$4 sm:$0xff] (!%p174_p3)   ;;  %v1011_v10 = vld [vmem:[%s1339_s1 + $0x40] ss:$8 sps:$4 sm:$0xff] (!%p174_p3)  }
   0xa   : > { %479 = vmatprep.subr.bf16.mxu0 (!%p174_p3), %v1000_v3  ;;  %957 = vmatprep.subr.bf16.mxu1 (!%p174_p3), %v1000_v3  ;;  %v1012_v11 = vld [vmem:[%s1339_s1 + $0x54] ss:$8 sps:$4 sm:$0xff] (!%p174_p3)   ;;  %v1014_v12 = vld [vmem:[%s1339_s1 + $0x50] ss:$8 sps:$4 sm:$0xff] (!%p174_p3)   ;;  %v1015_v13 = vld [vmem:[%s1339_s1 + $0x64] ss:$8 sps:$4 sm:$0xff] (!%p174_p3)  }
   0xb   : > { %v1017_v14 = vld [vmem:[%s1339_s1 + $0x60] ss:$8 sps:$4 sm:$0xff] (!%p174_p3)   ;;  %v1018_v15 = vld [vmem:[%s1339_s1 + $0x74] ss:$8 sps:$4 sm:$0xff] (!%p174_p3)   ;;  %v1020_v16 = vld [vmem:[%s1339_s1 + $0x70] ss:$8 sps:$4 sm:$0xff] (!%p174_p3)  }
   0xc   : > { %v292_v34 = vshrl.u32 (!%p174_p3), %v291_v33, 7  ;;  %v289_v36 = vld [vmem:[%s1340_s2] sm:$0x3] (!%p174_p3) }
   0xd   : > { %480 = vmatpush1.bf16.msra.mxu0 (!%p174_p3), %v1002_v4  ;;  %965 = vmatpush1.bf16.msra.mxu1 (!%p174_p3), %v1002_v4 }
   0xe   : > { %s1347_s18 = smov (!%p212_p4, %s916_s18), 63  ;;  %481 = vmatprep.subr.bf16.mxu0 %v1003_v5  ;;  %958 = vmatprep.subr.bf16.mxu1 %v1003_v5  ;;  %v293_v35 = vsub.s32 0, %v292_v34  ;;  %v297_v37 = vsub.s32 1, %v292_v34 }
   0xf   : > { %s917_s27 = sshll.u32 %s1347_s18, 2  ;;  %s955_s5 = sshll.u32 %s1347_s18, 4 }
  0x10   : > { %s1129_s7 = scalar_lea.vmem %s1338_s0, %s917_s27  ;;  %v1191_v38 = vrot.slane %v289_v36, %v293_v35  ;;  %v1193_v39 = vrot.slane %v289_v36, %v297_v37  ;;  %s1201_s8 = scalar_lea.vmem %s1341_s3, %s955_s5 }
  0x11   : > { %482 = vmatpush1.bf16.msra.mxu0 %v1005_v6  ;;  %966 = vmatpush1.bf16.msra.mxu1 %v1005_v6  ;;  %v1021_v17 = vld [vmem:[%s1129_s7] sm:$0xff]   ;;  %v1023_v19 = vld [vmem:[%s1129_s7 + $0x8] sm:$0xff]   ;;  %v1025_v21 = vld [vmem:[%s1129_s7 + $0x10] sm:$0xff]  }
  0x12   : > { %483 = vmatprep.subr.bf16.mxu0 %v1006_v7  ;;  %959 = vmatprep.subr.bf16.mxu1 %v1006_v7  ;;  %v1022_v18 = vld [vmem:[%s1129_s7 + $0x40] sm:$0xff]   ;;  %v1024_v20 = vld [vmem:[%s1129_s7 + $0x48] sm:$0xff]   ;;  %v1026_v22 = vld [vmem:[%s1129_s7 + $0x50] sm:$0xff]  }
  0x13   : > { %v1027_v23 = vld [vmem:[%s1129_s7 + $0x18] sm:$0xff]   ;;  %v1029_v25 = vld [vmem:[%s1129_s7 + $0x20] sm:$0xff]   ;;  %v1031_v27 = vld [vmem:[%s1129_s7 + $0x28] sm:$0xff]  }
  0x14   : > { %v1028_v24 = vld [vmem:[%s1129_s7 + $0x58] sm:$0xff]   ;;  %v1030_v26 = vld [vmem:[%s1129_s7 + $0x60] sm:$0xff]   ;;  %v1032_v28 = vld [vmem:[%s1129_s7 + $0x68] sm:$0xff]  }
  0x15   : > { %484 = vmatpush1.bf16.msra.mxu0 %v1008_v8  ;;  %967 = vmatpush1.bf16.msra.mxu1 %v1008_v8  ;;  %v1033_v29 = vld [vmem:[%s1129_s7 + $0x30] sm:$0xff]   ;;  %v1035_v31 = vld [vmem:[%s1129_s7 + $0x38] sm:$0xff]  }
  0x16   : > { %485 = vmatprep.subr.bf16.mxu0 %v1009_v9  ;;  %960 = vmatprep.subr.bf16.mxu1 %v1009_v9  ;;  %v1034_v30 = vld [vmem:[%s1129_s7 + $0x70] sm:$0xff]   ;;  %v1036_v32 = vld [vmem:[%s1129_s7 + $0x78] sm:$0xff]  }
  0x19   : > { %486 = vmatpush1.bf16.msra.mxu0 %v1011_v10  ;;  %968 = vmatpush1.bf16.msra.mxu1 %v1011_v10 }
  0x1a   : > { %487 = vmatprep.subr.bf16.mxu0 %v1012_v11  ;;  %961 = vmatprep.subr.bf16.mxu1 %v1012_v11 }
  0x1d   : > { %488 = vmatpush1.bf16.msra.mxu0 %v1014_v12  ;;  %969 = vmatpush1.bf16.msra.mxu1 %v1014_v12 }
  0x1e   : > { %489 = vmatprep.subr.bf16.mxu0 %v1015_v13  ;;  %962 = vmatprep.subr.bf16.mxu1 %v1015_v13 }
  0x21   : > { %490 = vmatpush1.bf16.msra.mxu0 %v1017_v14  ;;  %970 = vmatpush1.bf16.msra.mxu1 %v1017_v14 }
  0x22   : > { %491 = vmatprep.subr.bf16.mxu0 %v1018_v15  ;;  %963 = vmatprep.subr.bf16.mxu1 %v1018_v15 }
  0x25   : > { %492 = vmatpush1.bf16.msra.mxu0 %v1020_v16  ;;  %971 = vmatpush1.bf16.msra.mxu1 %v1020_v16 }
  0x28   : > { %510 = vmatmul.mubr.bf16.vlgmr.msra.gmra.mrb[0].mxu0 %v1021_v17  ;;  %590 = vmatmul.mubr.bf16.vlgmr.msra.gmra.mrb[0].mxu1 %v1022_v18 }
  0x29   : > { %519 = vmatprep.mubr.bf16.mxu0 %v1061_v2  ;;  %599 = vmatprep.mubr.bf16.mxu1 %v1061_v2 }
  0x30   : > { %520 = vmatmul.mubr.bf16.gmra.mrb[4].mxu0 %v1023_v19  ;;  %600 = vmatmul.mubr.bf16.gmra.mrb[4].mxu1 %v1024_v20 }
  0x31   : > { %529 = vmatprep.mubr.bf16.mxu0 %v1061_v2  ;;  %609 = vmatprep.mubr.bf16.mxu1 %v1061_v2 }
  0x38   : > { %530 = vmatmul.mubr.bf16.gmra.mrb[8].mxu0 %v1025_v21  ;;  %610 = vmatmul.mubr.bf16.gmra.mrb[8].mxu1 %v1026_v22 }
  0x39   : > { %539 = vmatprep.mubr.bf16.mxu0 %v1061_v2  ;;  %619 = vmatprep.mubr.bf16.mxu1 %v1061_v2 }
  0x40   : > { %540 = vmatmul.mubr.bf16.gmra.mrb[12].mxu0 %v1027_v23  ;;  %620 = vmatmul.mubr.bf16.gmra.mrb[12].mxu1 %v1028_v24 }
  0x41   : > { %549 = vmatprep.mubr.bf16.mxu0 %v1061_v2  ;;  %629 = vmatprep.mubr.bf16.mxu1 %v1061_v2 }
  0x48   : > { %550 = vmatmul.mubr.bf16.gmra.mrb[16].mxu0 %v1029_v25  ;;  %630 = vmatmul.mubr.bf16.gmra.mrb[16].mxu1 %v1030_v26 }
  0x49   : > { %559 = vmatprep.mubr.bf16.mxu0 %v1061_v2  ;;  %639 = vmatprep.mubr.bf16.mxu1 %v1061_v2 }
  0x50   : > { %560 = vmatmul.mubr.bf16.gmra.mrb[20].mxu0 %v1031_v27  ;;  %640 = vmatmul.mubr.bf16.gmra.mrb[20].mxu1 %v1032_v28 }
  0x51   : > { %569 = vmatprep.mubr.bf16.mxu0 %v1061_v2  ;;  %649 = vmatprep.mubr.bf16.mxu1 %v1061_v2 }
  0x58   : > { %570 = vmatmul.mubr.bf16.gmra.mrb[24].mxu0 %v1033_v29  ;;  %650 = vmatmul.mubr.bf16.gmra.mrb[24].mxu1 %v1034_v30 }
  0x59   : > { %579 = vmatprep.mubr.bf16.mxu0 %v1061_v2  ;;  %659 = vmatprep.mubr.bf16.mxu1 %v1061_v2 }
  0x60   : > { %580 = vmatmul.mubr.bf16.gmra.mrb[28].mxu0 %v1035_v31  ;;  %660 = vmatmul.mubr.bf16.gmra.mrb[28].mxu1 %v1036_v32 }
  0xfb   : > { %v511_v40 = vpop.f32.mrb[0].mxu0  ;;  %v591_v41 = vpop.f32.mrb[0].mxu1 }
  0xfc   : > { %v512_v42 = vadd.f32 %v511_v40, %v1191_v38  ;;  %v592_v43 = vadd.f32 %v591_v41, %v1191_v38  ;;  %v513_v44 = vpop.f32.mrb[1].mxu0  ;;  %v593_v45 = vpop.f32.mrb[1].mxu1 }
  0xfd   : > { %v514_v46 = vadd.f32 %v513_v44, %v1193_v39  ;;  %v594_v47 = vadd.f32 %v593_v45, %v1193_v39  ;;  %v515_v48 = vpop.f32.mrb[2].mxu0  ;;  %v595_v49 = vpop.f32.mrb[2].mxu1 }
  0xfe   : > { %v670_v50 = vmax.f32 %v512_v42, 0.0  ;;  %v702_v51 = vmax.f32 %v592_v43, 0.0  ;;  %v516_v52 = vadd.f32 %v515_v48, %v1191_v38  ;;  %v596_v53 = vadd.f32 %v595_v49, %v1191_v38  ;;  %v517_v54 = vpop.f32.mrb[3].mxu0  ;;  %v597_v55 = vpop.f32.mrb[3].mxu1 }
  0xff   : > { %v671_v56 = vmax.f32 %v514_v46, 0.0  ;;  %v703_v57 = vmax.f32 %v594_v47, 0.0  ;;  %v518_v58 = vadd.f32 %v517_v54, %v1193_v39  ;;  %v598_v59 = vadd.f32 %v597_v55, %v1193_v39 }
 0x100   : > { %734 = vst [vmem:[%s1201_s8] sm:$0xff] %v670_v50  ;;  %766 = vst [vmem:[%s1201_s8 + $0x100] sm:$0xff] %v702_v51  ;;  %v672_v60 = vmax.f32 %v516_v52, 0.0  ;;  %v704_v61 = vmax.f32 %v596_v53, 0.0 }
 0x101   : > { %735 = vst [vmem:[%s1201_s8 + $0x8] sm:$0xff] %v671_v56  ;;  %767 = vst [vmem:[%s1201_s8 + $0x108] sm:$0xff] %v703_v57  ;;  %v673_v62 = vmax.f32 %v518_v58, 0.0  ;;  %v705_v63 = vmax.f32 %v598_v59, 0.0 }
 0x102   : > { %736 = vst [vmem:[%s1201_s8 + $0x10] sm:$0xff] %v672_v60  ;;  %768 = vst [vmem:[%s1201_s8 + $0x110] sm:$0xff] %v704_v61 }
 0x103   : > { %737 = vst [vmem:[%s1201_s8 + $0x18] sm:$0xff] %v673_v62  ;;  %769 = vst [vmem:[%s1201_s8 + $0x118] sm:$0xff] %v705_v63  ;;  %v521_v0 = vpop.f32.mrb[4].mxu0  ;;  %v601_v1 = vpop.f32.mrb[4].mxu1 }
 0x104   : > { %v522_v2 = vadd.f32 %v521_v0, %v1191_v38  ;;  %v602_v3 = vadd.f32 %v601_v1, %v1191_v38  ;;  %v523_v4 = vpop.f32.mrb[5].mxu0  ;;  %v603_v5 = vpop.f32.mrb[5].mxu1 }
 0x105   : > { %v524_v6 = vadd.f32 %v523_v4, %v1193_v39  ;;  %v604_v7 = vadd.f32 %v603_v5, %v1193_v39  ;;  %v525_v8 = vpop.f32.mrb[6].mxu0  ;;  %v605_v9 = vpop.f32.mrb[6].mxu1 }
 0x106   : > { %v674_v10 = vmax.f32 %v522_v2, 0.0  ;;  %v706_v11 = vmax.f32 %v602_v3, 0.0  ;;  %v526_v12 = vadd.f32 %v525_v8, %v1191_v38  ;;  %v606_v13 = vadd.f32 %v605_v9, %v1191_v38  ;;  %v527_v14 = vpop.f32.mrb[7].mxu0  ;;  %v607_v15 = vpop.f32.mrb[7].mxu1 }
 0x107   : > { %v675_v16 = vmax.f32 %v524_v6, 0.0  ;;  %v707_v17 = vmax.f32 %v604_v7, 0.0  ;;  %v528_v18 = vadd.f32 %v527_v14, %v1193_v39  ;;  %v608_v19 = vadd.f32 %v607_v15, %v1193_v39 }
 0x108   : > { %738 = vst [vmem:[%s1201_s8 + $0x20] sm:$0xff] %v674_v10  ;;  %770 = vst [vmem:[%s1201_s8 + $0x120] sm:$0xff] %v706_v11  ;;  %v676_v20 = vmax.f32 %v526_v12, 0.0  ;;  %v708_v21 = vmax.f32 %v606_v13, 0.0 }
 0x109   : > { %739 = vst [vmem:[%s1201_s8 + $0x28] sm:$0xff] %v675_v16  ;;  %771 = vst [vmem:[%s1201_s8 + $0x128] sm:$0xff] %v707_v17  ;;  %v677_v22 = vmax.f32 %v528_v18, 0.0  ;;  %v709_v23 = vmax.f32 %v608_v19, 0.0 }
 0x10a   : > { %740 = vst [vmem:[%s1201_s8 + $0x30] sm:$0xff] %v676_v20  ;;  %772 = vst [vmem:[%s1201_s8 + $0x130] sm:$0xff] %v708_v21 }
 0x10b   : > { %741 = vst [vmem:[%s1201_s8 + $0x38] sm:$0xff] %v677_v22  ;;  %773 = vst [vmem:[%s1201_s8 + $0x138] sm:$0xff] %v709_v23  ;;  %v531_v24 = vpop.f32.mrb[8].mxu0  ;;  %v611_v25 = vpop.f32.mrb[8].mxu1 }
 0x10c   : > { %v532_v26 = vadd.f32 %v531_v24, %v1191_v38  ;;  %v612_v27 = vadd.f32 %v611_v25, %v1191_v38  ;;  %v533_v28 = vpop.f32.mrb[9].mxu0  ;;  %v613_v29 = vpop.f32.mrb[9].mxu1 }
 0x10d   : > { %v534_v30 = vadd.f32 %v533_v28, %v1193_v39  ;;  %v614_v31 = vadd.f32 %v613_v29, %v1193_v39  ;;  %v535_v32 = vpop.f32.mrb[10].mxu0  ;;  %v615_v33 = vpop.f32.mrb[10].mxu1 }
 0x10e   : > { %v678_v34 = vmax.f32 %v532_v26, 0.0  ;;  %v710_v35 = vmax.f32 %v612_v27, 0.0  ;;  %v536_v36 = vadd.f32 %v535_v32, %v1191_v38  ;;  %v616_v37 = vadd.f32 %v615_v33, %v1191_v38  ;;  %v537_v40 = vpop.f32.mrb[11].mxu0  ;;  %v617_v41 = vpop.f32.mrb[11].mxu1 }
 0x10f   : > { %v679_v42 = vmax.f32 %v534_v30, 0.0  ;;  %v711_v43 = vmax.f32 %v614_v31, 0.0  ;;  %v538_v44 = vadd.f32 %v537_v40, %v1193_v39  ;;  %v618_v45 = vadd.f32 %v617_v41, %v1193_v39 }
 0x110   : > { %742 = vst [vmem:[%s1201_s8 + $0x40] sm:$0xff] %v678_v34  ;;  %774 = vst [vmem:[%s1201_s8 + $0x140] sm:$0xff] %v710_v35  ;;  %v680_v46 = vmax.f32 %v536_v36, 0.0  ;;  %v712_v47 = vmax.f32 %v616_v37, 0.0 }
 0x111   : > { %743 = vst [vmem:[%s1201_s8 + $0x48] sm:$0xff] %v679_v42  ;;  %775 = vst [vmem:[%s1201_s8 + $0x148] sm:$0xff] %v711_v43  ;;  %v681_v48 = vmax.f32 %v538_v44, 0.0  ;;  %v713_v49 = vmax.f32 %v618_v45, 0.0 }
 0x112   : > { %744 = vst [vmem:[%s1201_s8 + $0x50] sm:$0xff] %v680_v46  ;;  %776 = vst [vmem:[%s1201_s8 + $0x150] sm:$0xff] %v712_v47 }
 0x113   : > { %745 = vst [vmem:[%s1201_s8 + $0x58] sm:$0xff] %v681_v48  ;;  %777 = vst [vmem:[%s1201_s8 + $0x158] sm:$0xff] %v713_v49  ;;  %v541_v50 = vpop.f32.mrb[12].mxu0  ;;  %v621_v51 = vpop.f32.mrb[12].mxu1 }
 0x114   : > { %v542_v52 = vadd.f32 %v541_v50, %v1191_v38  ;;  %v622_v53 = vadd.f32 %v621_v51, %v1191_v38  ;;  %v543_v54 = vpop.f32.mrb[13].mxu0  ;;  %v623_v55 = vpop.f32.mrb[13].mxu1 }
 0x115   : > { %v544_v56 = vadd.f32 %v543_v54, %v1193_v39  ;;  %v624_v57 = vadd.f32 %v623_v55, %v1193_v39  ;;  %v545_v58 = vpop.f32.mrb[14].mxu0  ;;  %v625_v59 = vpop.f32.mrb[14].mxu1 }
 0x116   : > { %v682_v60 = vmax.f32 %v542_v52, 0.0  ;;  %v714_v61 = vmax.f32 %v622_v53, 0.0  ;;  %v546_v62 = vadd.f32 %v545_v58, %v1191_v38  ;;  %v626_v63 = vadd.f32 %v625_v59, %v1191_v38  ;;  %v547_v0 = vpop.f32.mrb[15].mxu0  ;;  %v627_v1 = vpop.f32.mrb[15].mxu1 }
 0x117   : > { %v683_v2 = vmax.f32 %v544_v56, 0.0  ;;  %v715_v3 = vmax.f32 %v624_v57, 0.0  ;;  %v548_v4 = vadd.f32 %v547_v0, %v1193_v39  ;;  %v628_v5 = vadd.f32 %v627_v1, %v1193_v39 }
 0x118   : > { %746 = vst [vmem:[%s1201_s8 + $0x60] sm:$0xff] %v682_v60  ;;  %778 = vst [vmem:[%s1201_s8 + $0x160] sm:$0xff] %v714_v61  ;;  %v684_v6 = vmax.f32 %v546_v62, 0.0  ;;  %v716_v7 = vmax.f32 %v626_v63, 0.0 }
 0x119   : > { %747 = vst [vmem:[%s1201_s8 + $0x68] sm:$0xff] %v683_v2  ;;  %779 = vst [vmem:[%s1201_s8 + $0x168] sm:$0xff] %v715_v3  ;;  %v685_v8 = vmax.f32 %v548_v4, 0.0  ;;  %v717_v9 = vmax.f32 %v628_v5, 0.0 }
 0x11a   : > { %748 = vst [vmem:[%s1201_s8 + $0x70] sm:$0xff] %v684_v6  ;;  %780 = vst [vmem:[%s1201_s8 + $0x170] sm:$0xff] %v716_v7 }
 0x11b   : > { %749 = vst [vmem:[%s1201_s8 + $0x78] sm:$0xff] %v685_v8  ;;  %781 = vst [vmem:[%s1201_s8 + $0x178] sm:$0xff] %v717_v9  ;;  %v551_v10 = vpop.f32.mrb[16].mxu0  ;;  %v631_v11 = vpop.f32.mrb[16].mxu1 }
 0x11c   : > { %v552_v12 = vadd.f32 %v551_v10, %v1191_v38  ;;  %v632_v13 = vadd.f32 %v631_v11, %v1191_v38  ;;  %v553_v14 = vpop.f32.mrb[17].mxu0  ;;  %v633_v15 = vpop.f32.mrb[17].mxu1 }
 0x11d   : > { %v554_v16 = vadd.f32 %v553_v14, %v1193_v39  ;;  %v634_v17 = vadd.f32 %v633_v15, %v1193_v39  ;;  %v555_v18 = vpop.f32.mrb[18].mxu0  ;;  %v635_v19 = vpop.f32.mrb[18].mxu1 }
 0x11e   : > { %v686_v20 = vmax.f32 %v552_v12, 0.0  ;;  %v718_v21 = vmax.f32 %v632_v13, 0.0  ;;  %v556_v22 = vadd.f32 %v555_v18, %v1191_v38  ;;  %v636_v23 = vadd.f32 %v635_v19, %v1191_v38  ;;  %v557_v24 = vpop.f32.mrb[19].mxu0  ;;  %v637_v25 = vpop.f32.mrb[19].mxu1 }
 0x11f   : > { %v687_v26 = vmax.f32 %v554_v16, 0.0  ;;  %v719_v27 = vmax.f32 %v634_v17, 0.0  ;;  %v558_v28 = vadd.f32 %v557_v24, %v1193_v39  ;;  %v638_v29 = vadd.f32 %v637_v25, %v1193_v39 }
 0x120   : > { %750 = vst [vmem:[%s1201_s8 + $0x80] sm:$0xff] %v686_v20  ;;  %782 = vst [vmem:[%s1201_s8 + $0x180] sm:$0xff] %v718_v21  ;;  %v688_v30 = vmax.f32 %v556_v22, 0.0  ;;  %v720_v31 = vmax.f32 %v636_v23, 0.0 }
 0x121   : > { %751 = vst [vmem:[%s1201_s8 + $0x88] sm:$0xff] %v687_v26  ;;  %783 = vst [vmem:[%s1201_s8 + $0x188] sm:$0xff] %v719_v27  ;;  %v689_v32 = vmax.f32 %v558_v28, 0.0  ;;  %v721_v33 = vmax.f32 %v638_v29, 0.0 }
 0x122   : > { %752 = vst [vmem:[%s1201_s8 + $0x90] sm:$0xff] %v688_v30  ;;  %784 = vst [vmem:[%s1201_s8 + $0x190] sm:$0xff] %v720_v31 }
 0x123   : > { %753 = vst [vmem:[%s1201_s8 + $0x98] sm:$0xff] %v689_v32  ;;  %785 = vst [vmem:[%s1201_s8 + $0x198] sm:$0xff] %v721_v33  ;;  %v561_v34 = vpop.f32.mrb[20].mxu0  ;;  %v641_v35 = vpop.f32.mrb[20].mxu1 }
 0x124   : > { %v562_v36 = vadd.f32 %v561_v34, %v1191_v38  ;;  %v642_v37 = vadd.f32 %v641_v35, %v1191_v38  ;;  %v563_v40 = vpop.f32.mrb[21].mxu0  ;;  %v643_v41 = vpop.f32.mrb[21].mxu1 }
 0x125   : > { %v564_v42 = vadd.f32 %v563_v40, %v1193_v39  ;;  %v644_v43 = vadd.f32 %v643_v41, %v1193_v39  ;;  %v565_v44 = vpop.f32.mrb[22].mxu0  ;;  %v645_v45 = vpop.f32.mrb[22].mxu1 }
 0x126   : > { %v690_v46 = vmax.f32 %v562_v36, 0.0  ;;  %v722_v47 = vmax.f32 %v642_v37, 0.0  ;;  %v566_v48 = vadd.f32 %v565_v44, %v1191_v38  ;;  %v646_v49 = vadd.f32 %v645_v45, %v1191_v38  ;;  %v567_v50 = vpop.f32.mrb[23].mxu0  ;;  %v647_v51 = vpop.f32.mrb[23].mxu1 }
 0x127   : > { %v691_v52 = vmax.f32 %v564_v42, 0.0  ;;  %v723_v53 = vmax.f32 %v644_v43, 0.0  ;;  %v568_v54 = vadd.f32 %v567_v50, %v1193_v39  ;;  %v648_v55 = vadd.f32 %v647_v51, %v1193_v39 }
 0x128   : > { %754 = vst [vmem:[%s1201_s8 + $0xa0] sm:$0xff] %v690_v46  ;;  %786 = vst [vmem:[%s1201_s8 + $0x1a0] sm:$0xff] %v722_v47  ;;  %v692_v56 = vmax.f32 %v566_v48, 0.0  ;;  %v724_v57 = vmax.f32 %v646_v49, 0.0 }
 0x129   : > { %755 = vst [vmem:[%s1201_s8 + $0xa8] sm:$0xff] %v691_v52  ;;  %787 = vst [vmem:[%s1201_s8 + $0x1a8] sm:$0xff] %v723_v53  ;;  %v693_v58 = vmax.f32 %v568_v54, 0.0  ;;  %v725_v59 = vmax.f32 %v648_v55, 0.0 }
 0x12a   : > { %756 = vst [vmem:[%s1201_s8 + $0xb0] sm:$0xff] %v692_v56  ;;  %788 = vst [vmem:[%s1201_s8 + $0x1b0] sm:$0xff] %v724_v57 }
 0x12b   : > { %757 = vst [vmem:[%s1201_s8 + $0xb8] sm:$0xff] %v693_v58  ;;  %789 = vst [vmem:[%s1201_s8 + $0x1b8] sm:$0xff] %v725_v59  ;;  %v571_v60 = vpop.f32.mrb[24].mxu0  ;;  %v651_v61 = vpop.f32.mrb[24].mxu1 }
 0x12c   : > { %v572_v62 = vadd.f32 %v571_v60, %v1191_v38  ;;  %v652_v63 = vadd.f32 %v651_v61, %v1191_v38  ;;  %v573_v0 = vpop.f32.mrb[25].mxu0  ;;  %v653_v1 = vpop.f32.mrb[25].mxu1 }
 0x12d   : > { %v574_v2 = vadd.f32 %v573_v0, %v1193_v39  ;;  %v654_v3 = vadd.f32 %v653_v1, %v1193_v39  ;;  %v575_v4 = vpop.f32.mrb[26].mxu0  ;;  %v655_v5 = vpop.f32.mrb[26].mxu1 }
 0x12e   : > { %v694_v6 = vmax.f32 %v572_v62, 0.0  ;;  %v726_v7 = vmax.f32 %v652_v63, 0.0  ;;  %v576_v8 = vadd.f32 %v575_v4, %v1191_v38  ;;  %v656_v9 = vadd.f32 %v655_v5, %v1191_v38  ;;  %v577_v10 = vpop.f32.mrb[27].mxu0  ;;  %v657_v11 = vpop.f32.mrb[27].mxu1 }
 0x12f   : > { %v695_v12 = vmax.f32 %v574_v2, 0.0  ;;  %v727_v13 = vmax.f32 %v654_v3, 0.0  ;;  %v578_v14 = vadd.f32 %v577_v10, %v1193_v39  ;;  %v658_v15 = vadd.f32 %v657_v11, %v1193_v39 }
 0x130   : > { %758 = vst [vmem:[%s1201_s8 + $0xc0] sm:$0xff] %v694_v6  ;;  %790 = vst [vmem:[%s1201_s8 + $0x1c0] sm:$0xff] %v726_v7  ;;  %v696_v16 = vmax.f32 %v576_v8, 0.0  ;;  %v728_v17 = vmax.f32 %v656_v9, 0.0 }
 0x131   : > { %759 = vst [vmem:[%s1201_s8 + $0xc8] sm:$0xff] %v695_v12  ;;  %791 = vst [vmem:[%s1201_s8 + $0x1c8] sm:$0xff] %v727_v13  ;;  %v697_v18 = vmax.f32 %v578_v14, 0.0  ;;  %v729_v19 = vmax.f32 %v658_v15, 0.0 }
 0x132   : > { %760 = vst [vmem:[%s1201_s8 + $0xd0] sm:$0xff] %v696_v16  ;;  %792 = vst [vmem:[%s1201_s8 + $0x1d0] sm:$0xff] %v728_v17 }
 0x133   : > { %761 = vst [vmem:[%s1201_s8 + $0xd8] sm:$0xff] %v697_v18  ;;  %793 = vst [vmem:[%s1201_s8 + $0x1d8] sm:$0xff] %v729_v19  ;;  %v581_v20 = vpop.f32.mrb[28].mxu0  ;;  %v661_v21 = vpop.f32.mrb[28].mxu1 }
 0x134   : > { %v582_v22 = vadd.f32 %v581_v20, %v1191_v38  ;;  %v662_v23 = vadd.f32 %v661_v21, %v1191_v38  ;;  %v583_v24 = vpop.f32.mrb[29].mxu0  ;;  %v663_v25 = vpop.f32.mrb[29].mxu1 }
 0x135   : > { %v584_v26 = vadd.f32 %v583_v24, %v1193_v39  ;;  %v664_v27 = vadd.f32 %v663_v25, %v1193_v39  ;;  %v585_v28 = vpop.f32.mrb[30].mxu0  ;;  %v665_v29 = vpop.f32.mrb[30].mxu1 }
 0x136   : > { %v698_v30 = vmax.f32 %v582_v22, 0.0  ;;  %v730_v31 = vmax.f32 %v662_v23, 0.0  ;;  %v586_v32 = vadd.f32 %v585_v28, %v1191_v38  ;;  %v666_v33 = vadd.f32 %v665_v29, %v1191_v38  ;;  %v587_v34 = vpop.f32.mrb[31].mxu0  ;;  %v667_v35 = vpop.f32.mrb[31].mxu1 }
 0x137   : > { %v699_v36 = vmax.f32 %v584_v26, 0.0  ;;  %v731_v37 = vmax.f32 %v664_v27, 0.0  ;;  %v588_v40 = vadd.f32 %v587_v34, %v1193_v39  ;;  %v668_v41 = vadd.f32 %v667_v35, %v1193_v39 }
 0x138   : > { %762 = vst [vmem:[%s1201_s8 + $0xe0] sm:$0xff] %v698_v30  ;;  %794 = vst [vmem:[%s1201_s8 + $0x1e0] sm:$0xff] %v730_v31  ;;  %v700_v42 = vmax.f32 %v586_v32, 0.0  ;;  %v732_v43 = vmax.f32 %v666_v33, 0.0 }
 0x139   : > { %763 = vst [vmem:[%s1201_s8 + $0xe8] sm:$0xff] %v699_v36  ;;  %795 = vst [vmem:[%s1201_s8 + $0x1e8] sm:$0xff] %v731_v37  ;;  %v701_v44 = vmax.f32 %v588_v40, 0.0  ;;  %v733_v45 = vmax.f32 %v668_v41, 0.0 }
 0x13a   : > { %764 = vst [vmem:[%s1201_s8 + $0xf0] sm:$0xff] %v700_v42  ;;  %796 = vst [vmem:[%s1201_s8 + $0x1f0] sm:$0xff] %v732_v43 }
 0x13b   : > { %765 = vst [vmem:[%s1201_s8 + $0xf8] sm:$0xff] %v701_v44  ;;  %797 = vst [vmem:[%s1201_s8 + $0x1f8] sm:$0xff] %v733_v45 }
 0x13c PF: > { %s13_s14 = sadd.s32 1, %s1059_s14   ;;  %s1342_s12 = smov %s1055_s13 }
 0x13d   : > { %p10_p5 = scmp.ge.s32.totalorder %s13_s14, 4   ;;  %s1343_s13 = smov %s1345_s15 }
 0x13f   :  { %12 = sbr.rel (!%p10_p5) target bundleno = 2 (0x2), region = 68 }

// kernel: inception_red_forward.7
= control target key start
LH: loop header
LB: loop body
LE: loop exit
PB: predicated region body
PF: predicated region fallthrough
CT: control target
= control target key end

     0   :  { %s3281_s12 = smov 0   ;;  %s3283_s13 = smov 0   ;;  %s4042_s0 = inlined_call_operand.vmem [shape: bf16[112,1664], index: 0, kind: input, shape index: {}]   ;;  %s4043_s1 = inlined_call_operand.vmem [shape: bf16[1664,256], index: 1, kind: input, shape index: {}]   ;;  %s4044_s2 = inlined_call_operand.vmem [shape: f32[1,256], index: 2, kind: input, shape index: {}]   ;;  %s4045_s3 = inlined_call_operand.vmem [shape: f32[112,256], index: 3, kind: output, shape index: {}]  }
   0x1   :  { %s3285_s14 = smov 0  }
   0x2 LB: > { %s25_s15 = sadd.s32 1, %s3254_s13  ;;  %p2439_p0 = scmp.ge.s32.totalorder %s3258_s14, 1  ;;  %s3258_s14 = sphi %s3285_s14, %s13_s14   ;;  %s3254_s13 = sphi %s3283_s13, %s4047_s13   ;;  %s3250_s12 = sphi %s3281_s12, %s4046_s12  }
   0x3   : > { %p27_p1 = scmp.ge.s32.totalorder %s25_s15, 2  ;;  %p174_p2 = scmp.lt.s32.totalorder %s3258_s14, 3 }
   0x5   : > { %s4049_s15 = smov (%p27_p1, %s25_s15), 0  ;;  %p175_p3 = pnand %p2439_p0, %p174_p2 }
   0x6   : > { %v2854_v0 = vld [vmem:[%s4043_s1 + $0x4] ss:$8 sps:$4 sm:$0xff] (!%p175_p3)   ;;  %v2858_v2 = vld [vmem:[%s4043_s1] ss:$8 sps:$4 sm:$0xff] (!%p175_p3)   ;;  %v2860_v4 = vld [vmem:[%s4043_s1 + $0x14] ss:$8 sps:$4 sm:$0xff] (!%p175_p3)  }
   0x7   : > { %178 = sbr.rel (%p175_p3) target bundleno = 460 (0x1cc), region = 32  ;;  %v2856_v1 = vld [vmem:[%s4043_s1 + $0x304] ss:$8 sps:$4 sm:$0xff] (!%p175_p3)   ;;  %1797 = vmatprep.subr.bf16.mxu1 (!%p175_p3), %v2854_v0  ;;  %v2859_v3 = vld [vmem:[%s4043_s1 + $0x300] ss:$8 sps:$4 sm:$0xff] (!%p175_p3)  }
   0x8   : > { %2010 = vmatprep.subr.bf16.mxu0 (!%p175_p3), %v2856_v1  ;;  %1798 = vmatpush1.bf16.msra.mxu1 (!%p175_p3), %v2858_v2  ;;  %v2862_v5 = vld [vmem:[%s4043_s1 + $0x314] ss:$8 sps:$4 sm:$0xff] (!%p175_p3)   ;;  %v2864_v6 = vld [vmem:[%s4043_s1 + $0x10] ss:$8 sps:$4 sm:$0xff] (!%p175_p3)   ;;  %v2866_v8 = vld [vmem:[%s4043_s1 + $0x24] ss:$8 sps:$4 sm:$0xff] (!%p175_p3)  }
   0x9   : > { %2011 = vmatpush1.bf16.msra.mxu0 (!%p175_p3), %v2859_v3  ;;  %1799 = vmatprep.subr.bf16.mxu1 (!%p175_p3), %v2860_v4  ;;  %v2865_v7 = vld [vmem:[%s4043_s1 + $0x310] ss:$8 sps:$4 sm:$0xff] (!%p175_p3)   ;;  %v2868_v9 = vld [vmem:[%s4043_s1 + $0x324] ss:$8 sps:$4 sm:$0xff] (!%p175_p3)   ;;  %v2870_v10 = vld [vmem:[%s4043_s1 + $0x20] ss:$8 sps:$4 sm:$0xff] (!%p175_p3)  }
   0xa   : > { %2012 = vmatprep.subr.bf16.mxu0 (!%p175_p3), %v2862_v5  ;;  %v2871_v11 = vld [vmem:[%s4043_s1 + $0x320] ss:$8 sps:$4 sm:$0xff] (!%p175_p3)   ;;  %v2872_v12 = vld [vmem:[%s4043_s1 + $0x34] ss:$8 sps:$4 sm:$0xff] (!%p175_p3)   ;;  %v2876_v14 = vld [vmem:[%s4043_s1 + $0x30] ss:$8 sps:$4 sm:$0xff] (!%p175_p3)  }
   0xb   : > { %v2874_v13 = vld [vmem:[%s4043_s1 + $0x334] ss:$8 sps:$4 sm:$0xff] (!%p175_p3)   ;;  %v2877_v15 = vld [vmem:[%s4043_s1 + $0x330] ss:$8 sps:$4 sm:$0xff] (!%p175_p3)   ;;  %v2878_v16 = vld [vmem:[%s4043_s1 + $0x44] ss:$8 sps:$4 sm:$0xff] (!%p175_p3)  }
   0xc   : > { %1800 = vmatpush1.bf16.msra.mxu1 (!%p175_p3), %v2864_v6  ;;  %v2880_v17 = vld [vmem:[%s4043_s1 + $0x344] ss:$8 sps:$4 sm:$0xff] (!%p175_p3)   ;;  %v2882_v18 = vld [vmem:[%s4043_s1 + $0x40] ss:$8 sps:$4 sm:$0xff] (!%p175_p3)   ;;  %v2884_v20 = vld [vmem:[%s4043_s1 + $0x54] ss:$8 sps:$4 sm:$0xff] (!%p175_p3)  }
   0xd   : > { %2013 = vmatpush1.bf16.msra.mxu0 (!%p175_p3), %v2865_v7  ;;  %1801 = vmatprep.subr.bf16.mxu1 (!%p175_p3), %v2866_v8  ;;  %v2883_v19 = vld [vmem:[%s4043_s1 + $0x340] ss:$8 sps:$4 sm:$0xff] (!%p175_p3)   ;;  %v2886_v21 = vld [vmem:[%s4043_s1 + $0x354] ss:$8 sps:$4 sm:$0xff] (!%p175_p3)   ;;  %v2888_v22 = vld [vmem:[%s4043_s1 + $0x50] ss:$8 sps:$4 sm:$0xff] (!%p175_p3)  }
   0xe   : > { %2014 = vmatprep.subr.bf16.mxu0 %v2868_v9  ;;  %v2889_v23 = vld [vmem:[%s4043_s1 + $0x350] ss:$8 sps:$4 sm:$0xff]   ;;  %v2890_v24 = vld [vmem:[%s4043_s1 + $0x64] ss:$8 sps:$4 sm:$0xff]   ;;  %v2894_v26 = vld [vmem:[%s4043_s1 + $0x60] ss:$8 sps:$4 sm:$0xff]  }
   0xf   : > { %v2892_v25 = vld [vmem:[%s4043_s1 + $0x364] ss:$8 sps:$4 sm:$0xff]   ;;  %v2895_v27 = vld [vmem:[%s4043_s1 + $0x360] ss:$8 sps:$4 sm:$0xff]   ;;  %v2896_v28 = vld [vmem:[%s4043_s1 + $0x74] ss:$8 sps:$4 sm:$0xff]  }
  0x10   : > { %1802 = vmatpush1.bf16.msra.mxu1 %v2870_v10  ;;  %s213_s28 = smul.u32 7, %s3250_s12  ;;  %v2898_v29 = vld [vmem:[%s4043_s1 + $0x374] ss:$8 sps:$4 sm:$0xff]   ;;  %v2900_v30 = vld [vmem:[%s4043_s1 + $0x70] ss:$8 sps:$4 sm:$0xff]  }
  0x11   : > { %2015 = vmatpush1.bf16.msra.mxu0 %v2871_v11  ;;  %1803 = vmatprep.subr.bf16.mxu1 %v2872_v12  ;;  %v2901_v31 = vld [vmem:[%s4043_s1 + $0x370] ss:$8 sps:$4 sm:$0xff]   ;;  %v2902_v32 = vld [vmem:[%s4043_s1 + $0x84] ss:$8 sps:$4 sm:$0xff]   ;;  %v2906_v34 = vld [vmem:[%s4043_s1 + $0x80] ss:$8 sps:$4 sm:$0xff]  }
  0x12   : > { %2016 = vmatprep.subr.bf16.mxu0 %v2874_v13  ;;  %p214_p4 = scmp.lt.s32.totalorder %s213_s28, 13  ;;  %v2904_v33 = vld [vmem:[%s4043_s1 + $0x384] ss:$8 sps:$4 sm:$0xff]   ;;  %v2907_v35 = vld [vmem:[%s4043_s1 + $0x380] ss:$8 sps:$4 sm:$0xff]  }
  0x13   : > { %v2908_v36 = vld [vmem:[%s4043_s1 + $0x94] ss:$8 sps:$4 sm:$0xff]   ;;  %v2912_v38 = vld [vmem:[%s4043_s1 + $0x90] ss:$8 sps:$4 sm:$0xff]   ;;  %v2914_v40 = vld [vmem:[%s4043_s1 + $0xa4] ss:$8 sps:$4 sm:$0xff]  }
  0x14   : > { %1804 = vmatpush1.bf16.msra.mxu1 %v2876_v14  ;;  %s4051_s28 = smov (!%p214_p4, %s213_s28), 13  ;;  %v2910_v37 = vld [vmem:[%s4043_s1 + $0x394] ss:$8 sps:$4 sm:$0xff]   ;;  %v2913_v39 = vld [vmem:[%s4043_s1 + $0x390] ss:$8 sps:$4 sm:$0xff]  }
  0x15   : > { %2017 = vmatpush1.bf16.msra.mxu0 %v2877_v15  ;;  %1805 = vmatprep.subr.bf16.mxu1 %v2878_v16  ;;  %s2828_s30 = smul.u32 52, %s4051_s28  ;;  %v2916_v41 = vld [vmem:[%s4043_s1 + $0x3a4] ss:$8 sps:$4 sm:$0xff]   ;;  %v2918_v42 = vld [vmem:[%s4043_s1 + $0xa0] ss:$8 sps:$4 sm:$0xff]  }
  0x16   : > { %2018 = vmatprep.subr.bf16.mxu0 %v2880_v17  ;;  %v2919_v43 = vld [vmem:[%s4043_s1 + $0x3a0] ss:$8 sps:$4 sm:$0xff]   ;;  %v2920_v44 = vld [vmem:[%s4043_s1 + $0xb4] ss:$8 sps:$4 sm:$0xff]   ;;  %v2924_v46 = vld [vmem:[%s4043_s1 + $0xb0] ss:$8 sps:$4 sm:$0xff]  }
  0x17   : > { %s3443_s17 = scalar_lea.vmem %s4042_s0, %s2828_s30  ;;  %v2922_v45 = vld [vmem:[%s4043_s1 + $0x3b4] ss:$8 sps:$4 sm:$0xff]   ;;  %v2925_v47 = vld [vmem:[%s4043_s1 + $0x3b0] ss:$8 sps:$4 sm:$0xff]   ;;  %v2926_v49 = vld [vmem:[%s4043_s1 + $0xc4] ss:$8 sps:$4 sm:$0xff]  }
  0x18   : > { %1806 = vmatpush1.bf16.msra.mxu1 %v2882_v18  ;;  %v2952_v48 = vld [vmem:[%s3443_s17 + $0x4] ss:$52 sps:$4 sm:$0xff]   ;;  %v2958_v51 = vld [vmem:[%s3443_s17 + $0x1c] ss:$52 sps:$4 sm:$0xff]   ;;  %v2930_v52 = vld [vmem:[%s4043_s1 + $0xc0] ss:$8 sps:$4 sm:$0xff]  }
  0x19   : > { %2019 = vmatpush1.bf16.msra.mxu0 %v2883_v19  ;;  %1807 = vmatprep.subr.bf16.mxu1 %v2884_v20  ;;  %v2928_v50 = vld [vmem:[%s4043_s1 + $0x3c4] ss:$8 sps:$4 sm:$0xff]   ;;  %v2931_v53 = vld [vmem:[%s4043_s1 + $0x3c0] ss:$8 sps:$4 sm:$0xff]   ;;  %v2932_v54 = vld [vmem:[%s4043_s1 + $0xd4] ss:$8 sps:$4 sm:$0xff]  }
  0x1a   : > { %2020 = vmatprep.subr.bf16.mxu0 %v2886_v21  ;;  %1829 = vmatprep.mubr.bf16.mxu1 %v2952_v48  ;;  %v2934_v55 = vld [vmem:[%s4043_s1 + $0x3d4] ss:$8 sps:$4 sm:$0xff]   ;;  %v2936_v56 = vld [vmem:[%s4043_s1 + $0xd0] ss:$8 sps:$4 sm:$0xff]   ;;  %v2938_v58 = vld [vmem:[%s4043_s1 + $0xe4] ss:$8 sps:$4 sm:$0xff]  }
  0x1b   : > { %2042 = vmatprep.mubr.bf16.mxu0 %v2958_v51  ;;  %v2937_v57 = vld [vmem:[%s4043_s1 + $0x3d0] ss:$8 sps:$4 sm:$0xff]   ;;  %v2940_v59 = vld [vmem:[%s4043_s1 + $0x3e4] ss:$8 sps:$4 sm:$0xff]   ;;  %v2942_v60 = vld [vmem:[%s4043_s1 + $0xe0] ss:$8 sps:$4 sm:$0xff]  }
  0x1c   : > { %1808 = vmatpush1.bf16.msra.mxu1 %v2888_v22  ;;  %v2943_v61 = vld [vmem:[%s4043_s1 + $0x3e0] ss:$8 sps:$4 sm:$0xff]   ;;  %v2944_v62 = vld [vmem:[%s4043_s1 + $0xf4] ss:$8 sps:$4 sm:$0xff]   ;;  %v2948_v0 = vld [vmem:[%s4043_s1 + $0xf0] ss:$8 sps:$4 sm:$0xff]  }
  0x1d   : > { %2021 = vmatpush1.bf16.msra.mxu0 %v2889_v23  ;;  %1809 = vmatprep.subr.bf16.mxu1 %v2890_v24  ;;  %v2946_v63 = vld [vmem:[%s4043_s1 + $0x3f4] ss:$8 sps:$4 sm:$0xff]   ;;  %v2949_v1 = vld [vmem:[%s4043_s1 + $0x3f0] ss:$8 sps:$4 sm:$0xff]   ;;  %v2955_v2 = vld [vmem:[%s4043_s1 + $0x104] ss:$8 sps:$4 sm:$0xff]  }
  0x1e   : > { %2022 = vmatprep.subr.bf16.mxu0 %v2892_v25  ;;  %v2961_v3 = vld [vmem:[%s4043_s1 + $0x404] ss:$8 sps:$4 sm:$0xff]   ;;  %v2950_v4 = vld [vmem:[%s3443_s17] ss:$52 sps:$4 sm:$0xff]   ;;  %v2962_v10 = vld [vmem:[%s4043_s1 + $0x110] ss:$8 sps:$4 sm:$0xff]  }
  0x1f   : > { %v2953_v5 = vld [vmem:[%s4043_s1 + $0x100] ss:$8 sps:$4 sm:$0xff]   ;;  %v2956_v6 = vld [vmem:[%s3443_s17 + $0x18] ss:$52 sps:$4 sm:$0xff]   ;;  %v2964_v8 = vld [vmem:[%s4043_s1 + $0x114] ss:$8 sps:$4 sm:$0xff]  }
  0x20   : > { %1810 = vmatpush1.bf16.msra.mxu1 %v2894_v26  ;;  %v2959_v7 = vld [vmem:[%s4043_s1 + $0x400] ss:$8 sps:$4 sm:$0xff]   ;;  %v2967_v9 = vld [vmem:[%s4043_s1 + $0x414] ss:$8 sps:$4 sm:$0xff]   ;;  %v2965_v11 = vld [vmem:[%s4043_s1 + $0x410] ss:$8 sps:$4 sm:$0xff]  }
  0x21   : > { %2023 = vmatpush1.bf16.msra.mxu0 %v2895_v27  ;;  %1811 = vmatprep.subr.bf16.mxu1 %v2896_v28  ;;  %v2970_v12 = vld [vmem:[%s4043_s1 + $0x124] ss:$8 sps:$4 sm:$0xff]   ;;  %v2968_v14 = vld [vmem:[%s4043_s1 + $0x120] ss:$8 sps:$4 sm:$0xff]   ;;  %v2976_v16 = vld [vmem:[%s4043_s1 + $0x134] ss:$8 sps:$4 sm:$0xff]  }
  0x22   : > { %2024 = vmatprep.subr.bf16.mxu0 %v2898_v29  ;;  %v2973_v13 = vld [vmem:[%s4043_s1 + $0x424] ss:$8 sps:$4 sm:$0xff]   ;;  %v2971_v15 = vld [vmem:[%s4043_s1 + $0x420] ss:$8 sps:$4 sm:$0xff]   ;;  %v2979_v18 = vld [vmem:[%s4043_s1 + $0x434] ss:$8 sps:$4 sm:$0xff]  }
  0x23   : > { %v3016_v17 = vld [vmem:[%s3443_s17 + $0x6c] ss:$52 sps:$4 sm:$0xff]   ;;  %v2974_v19 = vld [vmem:[%s4043_s1 + $0x130] ss:$8 sps:$4 sm:$0xff]   ;;  %v3026_v24 = vld [vmem:[%s3443_s17 + $0x68] ss:$52 sps:$4 sm:$0xff]  }
  0x24   : > { %1812 = vmatpush1.bf16.msra.mxu1 %v2900_v30  ;;  %v2977_v20 = vld [vmem:[%s4043_s1 + $0x430] ss:$8 sps:$4 sm:$0xff]   ;;  %v2982_v22 = vld [vmem:[%s4043_s1 + $0x144] ss:$8 sps:$4 sm:$0xff]   ;;  %v3027_v25 = vld [vmem:[%s3443_s17 + $0x80] ss:$52 sps:$4 sm:$0xff]  }
  0x25   : > { %2025 = vmatpush1.bf16.msra.mxu0 %v2901_v31  ;;  %1813 = vmatprep.subr.bf16.mxu1 %v2902_v32  ;;  %v3021_v21 = vld [vmem:[%s3443_s17 + $0x84] ss:$52 sps:$4 sm:$0xff]   ;;  %v2980_v26 = vld [vmem:[%s4043_s1 + $0x140] ss:$8 sps:$4 sm:$0xff]   ;;  %v2988_v28 = vld [vmem:[%s4043_s1 + $0x154] ss:$8 sps:$4 sm:$0xff]  }
  0x26   : > { %2026 = vmatprep.subr.bf16.mxu0 %v2904_v33  ;;  %v2985_v23 = vld [vmem:[%s4043_s1 + $0x444] ss:$8 sps:$4 sm:$0xff]   ;;  %v2983_v27 = vld [vmem:[%s4043_s1 + $0x440] ss:$8 sps:$4 sm:$0xff]   ;;  %v2991_v30 = vld [vmem:[%s4043_s1 + $0x454] ss:$8 sps:$4 sm:$0xff]  }
  0x27   : > { %v3034_v29 = vld [vmem:[%s3443_s17 + $0xd4] ss:$52 sps:$4 sm:$0xff]   ;;  %v2986_v31 = vld [vmem:[%s4043_s1 + $0x150] ss:$8 sps:$4 sm:$0xff]   ;;  %v3039_v33 = vld [vmem:[%s3443_s17 + $0xec] ss:$52 sps:$4 sm:$0xff]  }
  0x28   : > { %1814 = vmatpush1.bf16.msra.mxu1 %v2906_v34  ;;  %v2989_v32 = vld [vmem:[%s4043_s1 + $0x450] ss:$8 sps:$4 sm:$0xff]   ;;  %v2994_v34 = vld [vmem:[%s4043_s1 + $0x164] ss:$8 sps:$4 sm:$0xff]  }
  0x29   : > { %2027 = vmatpush1.bf16.msra.mxu0 %v2907_v35  ;;  %1815 = vmatprep.subr.bf16.mxu1 %v2908_v36  ;;  %v2997_v35 = vld [vmem:[%s4043_s1 + $0x464] ss:$8 sps:$4 sm:$0xff]   ;;  %v2998_v48 = vld [vmem:[%s4043_s1 + $0x170] ss:$8 sps:$4 sm:$0xff]  }
  0x2a   : > { %2028 = vmatprep.subr.bf16.mxu0 %v2910_v37  ;;  %v3044_v36 = vld [vmem:[%s3443_s17 + $0xd0] ss:$52 sps:$4 sm:$0xff]   ;;  %v3045_v37 = vld [vmem:[%s3443_s17 + $0xe8] ss:$52 sps:$4 sm:$0xff]  }
  0x2b   : > { %v3009_v51 = vld [vmem:[%s4043_s1 + $0x484] ss:$8 sps:$4 sm:$0xff]  }
  0x2c   : > { %1816 = vmatpush1.bf16.msra.mxu1 %v2912_v38  ;;  %v2992_v38 = vld [vmem:[%s4043_s1 + $0x160] ss:$8 sps:$4 sm:$0xff]  }
  0x2d   : > { %2029 = vmatpush1.bf16.msra.mxu0 %v2913_v39  ;;  %1817 = vmatprep.subr.bf16.mxu1 %v2914_v40  ;;  %v2995_v39 = vld [vmem:[%s4043_s1 + $0x460] ss:$8 sps:$4 sm:$0xff]   ;;  %v286_v40 = vld [vmem:[%s3443_s17 + $0x138] sm:$0xff] }
  0x2e   : > { %2030 = vmatprep.subr.bf16.mxu0 %v2916_v41  ;;  %v3000_v41 = vld [vmem:[%s4043_s1 + $0x174] ss:$8 sps:$4 sm:$0xff]  }
  0x30   : > { %1818 = vmatpush1.bf16.msra.mxu1 %v2918_v42  ;;  %v3003_v42 = vld [vmem:[%s4043_s1 + $0x474] ss:$8 sps:$4 sm:$0xff]  }
  0x31   : > { %2031 = vmatpush1.bf16.msra.mxu0 %v2919_v43  ;;  %1819 = vmatprep.subr.bf16.mxu1 %v2920_v44  ;;  %v2483_v43 = vcombine.high %v286_v40, %v286_v40  ;;  %v289_v44 = vld [vmem:[%s3443_s17 + $0x150] sm:$0xff] }
  0x32   : > { %2032 = vmatprep.subr.bf16.mxu0 %v2922_v45  ;;  %v2489_v45 = vcombine.high %v289_v44, %v289_v44 }
  0x34   : > { %1820 = vmatpush1.bf16.msra.mxu1 %v2924_v46  ;;  %v2482_v46 = vcombine.low %v286_v40, %v286_v40  ;;  %v3152_v40 = vld [vmem:[%s3443_s17 + $0xdc] ss:$52 sps:$4 sm:$0xff]  }
  0x35   : > { %2033 = vmatpush1.bf16.msra.mxu0 %v2925_v47  ;;  %1821 = vmatprep.subr.bf16.mxu1 %v2926_v49  ;;  %v2488_v47 = vcombine.low %v289_v44, %v289_v44  ;;  %v3001_v49 = vld [vmem:[%s4043_s1 + $0x470] ss:$8 sps:$4 sm:$0xff]   ;;  %v3100_v44 = vld [vmem:[%s4043_s1 + $0x244] ss:$8 sps:$4 sm:$0xff]  }
  0x36   : > { %2034 = vmatprep.subr.bf16.mxu0 %v2928_v50  ;;  %v3006_v50 = vld [vmem:[%s4043_s1 + $0x184] ss:$8 sps:$4 sm:$0xff]  }
  0x38   : > { %1822 = vmatpush1.bf16.msra.mxu1 %v2930_v52  ;;  %v3004_v52 = vld [vmem:[%s4043_s1 + $0x180] ss:$8 sps:$4 sm:$0xff]  }
  0x39   : > { %2035 = vmatpush1.bf16.msra.mxu0 %v2931_v53  ;;  %1823 = vmatprep.subr.bf16.mxu1 %v2932_v54  ;;  %v3070_v53 = vld [vmem:[%s3443_s17 + $0xc] ss:$52 sps:$4 sm:$0xff]  }
  0x3a   : > { %2036 = vmatprep.subr.bf16.mxu0 %v2934_v55  ;;  %v3007_v54 = vld [vmem:[%s4043_s1 + $0x480] ss:$8 sps:$4 sm:$0xff]   ;;  %v3012_v55 = vld [vmem:[%s4043_s1 + $0x194] ss:$8 sps:$4 sm:$0xff]  }
  0x3c   : > { %1824 = vmatpush1.bf16.msra.mxu1 %v2936_v56  ;;  %v3015_v56 = vld [vmem:[%s4043_s1 + $0x494] ss:$8 sps:$4 sm:$0xff]  }
  0x3d   : > { %2037 = vmatpush1.bf16.msra.mxu0 %v2937_v57  ;;  %1825 = vmatprep.subr.bf16.mxu1 %v2938_v58  ;;  %v3076_v57 = vld [vmem:[%s3443_s17 + $0x24] ss:$52 sps:$4 sm:$0xff]  }
  0x3e   : > { %2038 = vmatprep.subr.bf16.mxu0 %v2940_v59  ;;  %v3010_v58 = vld [vmem:[%s4043_s1 + $0x190] ss:$8 sps:$4 sm:$0xff]  }
  0x3f   : > { %v3013_v59 = vld [vmem:[%s4043_s1 + $0x490] ss:$8 sps:$4 sm:$0xff]  }
  0x40   : > { %1826 = vmatpush1.bf16.msra.mxu1 %v2942_v60  ;;  %v3020_v60 = vld [vmem:[%s4043_s1 + $0x1a4] ss:$8 sps:$4 sm:$0xff]  }
  0x41   : > { %2039 = vmatpush1.bf16.msra.mxu0 %v2943_v61  ;;  %1827 = vmatprep.subr.bf16.mxu1 %v2944_v62  ;;  %v3025_v61 = vld [vmem:[%s4043_s1 + $0x4a4] ss:$8 sps:$4 sm:$0xff]   ;;  %v3018_v62 = vld [vmem:[%s4043_s1 + $0x1a0] ss:$8 sps:$4 sm:$0xff]  }
  0x42   : > { %2040 = vmatprep.subr.bf16.mxu0 %v2946_v63  ;;  %v3023_v63 = vld [vmem:[%s4043_s1 + $0x4a0] ss:$8 sps:$4 sm:$0xff]  }
  0x44   : > { %1828 = vmatpush1.bf16.msra.mxu1 %v2948_v0  ;;  %v3030_v0 = vld [vmem:[%s4043_s1 + $0x1b4] ss:$8 sps:$4 sm:$0xff]  }
  0x45   : > { %2041 = vmatpush1.bf16.msra.mxu0 %v2949_v1  ;;  %1868 = vmatprep.subr.bf16.mxu1 %v2955_v2  ;;  %v3033_v1 = vld [vmem:[%s4043_s1 + $0x4b4] ss:$8 sps:$4 sm:$0xff]   ;;  %v3028_v2 = vld [vmem:[%s4043_s1 + $0x1b0] ss:$8 sps:$4 sm:$0xff]  }
  0x46   : > { %2081 = vmatprep.subr.bf16.mxu0 %v2961_v3  ;;  %v3031_v3 = vld [vmem:[%s4043_s1 + $0x4b0] ss:$8 sps:$4 sm:$0xff]  }
  0x47   : > { %1830 = vmatmul.mubr.bf16.vlgmr.msra.gmra.mrb[0].mxu1 %v2950_v4  ;;  %v3038_v4 = vld [vmem:[%s4043_s1 + $0x1c4] ss:$8 sps:$4 sm:$0xff]  }
  0x48   : > { %2043 = vmatmul.mubr.bf16.vlgmr.msra.gmra.mrb[0].mxu0 %v2956_v6  ;;  %1869 = vmatpush1.bf16.msra.mxu1 %v2953_v5  ;;  %v3043_v5 = vld [vmem:[%s4043_s1 + $0x4c4] ss:$8 sps:$4 sm:$0xff]   ;;  %v3036_v6 = vld [vmem:[%s4043_s1 + $0x1c0] ss:$8 sps:$4 sm:$0xff]  }
  0x49   : > { %2082 = vmatpush1.bf16.msra.mxu0 %v2959_v7  ;;  %1870 = vmatprep.subr.bf16.mxu1 %v2964_v8  ;;  %v3041_v7 = vld [vmem:[%s4043_s1 + $0x4c0] ss:$8 sps:$4 sm:$0xff]   ;;  %v3048_v8 = vld [vmem:[%s4043_s1 + $0x1d4] ss:$8 sps:$4 sm:$0xff]  }
  0x4a   : > { %2083 = vmatprep.subr.bf16.mxu0 %v2967_v9  ;;  %1839 = vmatprep.mubr.bf16.mxu1 %v3016_v17  ;;  %v3051_v9 = vld [vmem:[%s4043_s1 + $0x4d4] ss:$8 sps:$4 sm:$0xff]  }
  0x4b   : > { %2052 = vmatprep.mubr.bf16.mxu0 %v3021_v21  ;;  %v3067_v17 = vld [vmem:[%s4043_s1 + $0x4f4] ss:$8 sps:$4 sm:$0xff]   ;;  %v3079_v21 = vld [vmem:[%s4043_s1 + $0x504] ss:$8 sps:$4 sm:$0xff]  }
  0x4c   : > { %1871 = vmatpush1.bf16.msra.mxu1 %v2962_v10  ;;  %v3046_v10 = vld [vmem:[%s4043_s1 + $0x1d0] ss:$8 sps:$4 sm:$0xff]  }
  0x4d   : > { %2084 = vmatpush1.bf16.msra.mxu0 %v2965_v11  ;;  %1872 = vmatprep.subr.bf16.mxu1 %v2970_v12  ;;  %v3049_v11 = vld [vmem:[%s4043_s1 + $0x4d0] ss:$8 sps:$4 sm:$0xff]   ;;  %v3055_v12 = vld [vmem:[%s4043_s1 + $0x1e4] ss:$8 sps:$4 sm:$0xff]  }
  0x4e   : > { %2085 = vmatprep.subr.bf16.mxu0 %v2973_v13  ;;  %v3059_v13 = vld [vmem:[%s4043_s1 + $0x4e4] ss:$8 sps:$4 sm:$0xff]  }
  0x4f   : > { %1840 = vmatmul.mubr.bf16.gmra.mrb[4].mxu1 %v3026_v24  ;;  %v3074_v24 = vld [vmem:[%s3443_s17 + $0x20] ss:$52 sps:$4 sm:$0xff]  }
  0x50   : > { %1873 = vmatpush1.bf16.msra.mxu1 %v2968_v14  ;;  %2053 = vmatmul.mubr.bf16.gmra.mrb[4].mxu0 %v3027_v25  ;;  %v3053_v14 = vld [vmem:[%s4043_s1 + $0x1e0] ss:$8 sps:$4 sm:$0xff]  }
  0x51   : > { %2086 = vmatpush1.bf16.msra.mxu0 %v2971_v15  ;;  %1874 = vmatprep.subr.bf16.mxu1 %v2976_v16  ;;  %v3057_v15 = vld [vmem:[%s4043_s1 + $0x4e0] ss:$8 sps:$4 sm:$0xff]   ;;  %v3064_v16 = vld [vmem:[%s4043_s1 + $0x1f4] ss:$8 sps:$4 sm:$0xff]  }
  0x52   : > { %2087 = vmatprep.subr.bf16.mxu0 %v2979_v18  ;;  %1849 = vmatprep.mubr.bf16.mxu1 %v3034_v29  ;;  %v3062_v18 = vld [vmem:[%s4043_s1 + $0x1f0] ss:$8 sps:$4 sm:$0xff]   ;;  %v3077_v25 = vld [vmem:[%s4043_s1 + $0x500] ss:$8 sps:$4 sm:$0xff]  }
  0x53   : > { %2062 = vmatprep.mubr.bf16.mxu0 %v3039_v33  ;;  %v3136_v29 = vld [vmem:[%s3443_s17 + $0x8c] ss:$52 sps:$4 sm:$0xff]  }
  0x54   : > { %1875 = vmatpush1.bf16.msra.mxu1 %v2974_v19  ;;  %v3065_v19 = vld [vmem:[%s4043_s1 + $0x4f0] ss:$8 sps:$4 sm:$0xff]   ;;  %v3091_v33 = vld [vmem:[%s4043_s1 + $0x524] ss:$8 sps:$4 sm:$0xff]  }
  0x55   : > { %2088 = vmatpush1.bf16.msra.mxu0 %v2977_v20  ;;  %1876 = vmatprep.subr.bf16.mxu1 %v2982_v22  ;;  %v3073_v20 = vld [vmem:[%s4043_s1 + $0x204] ss:$8 sps:$4 sm:$0xff]   ;;  %v3068_v22 = vld [vmem:[%s3443_s17 + $0x8] ss:$52 sps:$4 sm:$0xff]  }
  0x56   : > { %2089 = vmatprep.subr.bf16.mxu0 %v2985_v23  ;;  %v3071_v23 = vld [vmem:[%s4043_s1 + $0x200] ss:$8 sps:$4 sm:$0xff]  }
  0x57   : > { %1850 = vmatmul.mubr.bf16.gmra.mrb[8].mxu1 %v3044_v36  ;;  %v3142_v36 = vld [vmem:[%s3443_s17 + $0x88] ss:$52 sps:$4 sm:$0xff]  }
  0x58   : > { %1877 = vmatpush1.bf16.msra.mxu1 %v2980_v26  ;;  %2063 = vmatmul.mubr.bf16.gmra.mrb[8].mxu0 %v3045_v37  ;;  %v3082_v26 = vld [vmem:[%s4043_s1 + $0x214] ss:$8 sps:$4 sm:$0xff]   ;;  %v3089_v37 = vld [vmem:[%s4043_s1 + $0x520] ss:$8 sps:$4 sm:$0xff]  }
  0x59   : > { %2090 = vmatpush1.bf16.msra.mxu0 %v2983_v27  ;;  %1878 = vmatprep.subr.bf16.mxu1 %v2988_v28  ;;  %v3085_v27 = vld [vmem:[%s4043_s1 + $0x514] ss:$8 sps:$4 sm:$0xff]  }
  0x5a   : > { %2091 = vmatprep.subr.bf16.mxu0 %v2991_v30  ;;  %1859 = vmatprep.mubr.bf16.mxu1 %v2483_v43  ;;  %v3134_v28 = vld [vmem:[%s3443_s17 + $0x74] ss:$52 sps:$4 sm:$0xff]   ;;  %v3080_v30 = vld [vmem:[%s4043_s1 + $0x210] ss:$8 sps:$4 sm:$0xff]  }
  0x5b   : > { %2072 = vmatprep.mubr.bf16.mxu0 %v2489_v45  ;;  %v3095_v43 = vld [vmem:[%s4043_s1 + $0x530] ss:$8 sps:$4 sm:$0xff]   ;;  %v3103_v45 = vld [vmem:[%s4043_s1 + $0x544] ss:$8 sps:$4 sm:$0xff]  }
  0x5c   : > { %1879 = vmatpush1.bf16.msra.mxu1 %v2986_v31  ;;  %v3083_v31 = vld [vmem:[%s4043_s1 + $0x510] ss:$8 sps:$4 sm:$0xff]  }
  0x5d   : > { %2092 = vmatpush1.bf16.msra.mxu0 %v2989_v32  ;;  %1880 = vmatprep.subr.bf16.mxu1 %v2994_v34  ;;  %v3088_v32 = vld [vmem:[%s4043_s1 + $0x224] ss:$8 sps:$4 sm:$0xff]   ;;  %v3086_v34 = vld [vmem:[%s4043_s1 + $0x220] ss:$8 sps:$4 sm:$0xff]  }
  0x5e   : > { %2093 = vmatprep.subr.bf16.mxu0 %v2997_v35  ;;  %v3138_v35 = vld [vmem:[%s3443_s17 + $0x70] ss:$52 sps:$4 sm:$0xff]  }
  0x5f   : > { %1860 = vmatmul.mubr.bf16.gmra.mrb[12].mxu1 %v2482_v46  ;;  %v3098_v46 = vld [vmem:[%s4043_s1 + $0x240] ss:$8 sps:$4 sm:$0xff]  }
  0x60   : > { %1881 = vmatpush1.bf16.msra.mxu1 %v2992_v38  ;;  %2073 = vmatmul.mubr.bf16.gmra.mrb[12].mxu0 %v2488_v47  ;;  %v3094_v38 = vld [vmem:[%s4043_s1 + $0x234] ss:$8 sps:$4 sm:$0xff]   ;;  %v3101_v47 = vld [vmem:[%s4043_s1 + $0x540] ss:$8 sps:$4 sm:$0xff]  }
  0x61   : > { %2094 = vmatpush1.bf16.msra.mxu0 %v2995_v39  ;;  %1882 = vmatprep.subr.bf16.mxu1 %v3000_v41  ;;  %v3097_v39 = vld [vmem:[%s4043_s1 + $0x534] ss:$8 sps:$4 sm:$0xff]  }
  0x62   : > { %2095 = vmatprep.subr.bf16.mxu0 %v3003_v42  ;;  %1900 = vmatprep.mubr.bf16.mxu1 %v3070_v53  ;;  %v3154_v41 = vld [vmem:[%s3443_s17 + $0xf4] ss:$52 sps:$4 sm:$0xff]   ;;  %v3092_v42 = vld [vmem:[%s4043_s1 + $0x230] ss:$8 sps:$4 sm:$0xff]  }
  0x63   : > { %2113 = vmatprep.mubr.bf16.mxu0 %v3076_v57  ;;  %v3109_v53 = vld [vmem:[%s4043_s1 + $0x554] ss:$8 sps:$4 sm:$0xff]   ;;  %v3107_v57 = vld [vmem:[%s4043_s1 + $0x550] ss:$8 sps:$4 sm:$0xff]  }
  0x64   : > { %1883 = vmatpush1.bf16.msra.mxu1 %v2998_v48  ;;  %v3156_v48 = vld [vmem:[%s3443_s17 + $0xd8] ss:$52 sps:$4 sm:$0xff]  }
  0x65   : > { %2096 = vmatpush1.bf16.msra.mxu0 %v3001_v49  ;;  %1884 = vmatprep.subr.bf16.mxu1 %v3006_v50  ;;  %v3160_v49 = vld [vmem:[%s3443_s17 + $0xf0] ss:$52 sps:$4 sm:$0xff]  }
  0x66   : > { %2097 = vmatprep.subr.bf16.mxu0 %v3009_v51  ;;  %v287_v50 = vld [vmem:[%s3443_s17 + $0x140] sm:$0xff]  ;;  %v290_v51 = vld [vmem:[%s3443_s17 + $0x158] sm:$0xff] }
  0x68   : > { %1885 = vmatpush1.bf16.msra.mxu1 %v3004_v52  ;;  %v3106_v52 = vld [vmem:[%s4043_s1 + $0x254] ss:$8 sps:$4 sm:$0xff]  }
  0x69   : > { %2098 = vmatpush1.bf16.msra.mxu0 %v3007_v54  ;;  %1886 = vmatprep.subr.bf16.mxu1 %v3012_v55  ;;  %v2485_v54 = vcombine.high %v287_v50, %v287_v50  ;;  %v2491_v55 = vcombine.high %v290_v51, %v290_v51 }
  0x6a   : > { %2099 = vmatprep.subr.bf16.mxu0 %v3015_v56  ;;  %v3104_v56 = vld [vmem:[%s4043_s1 + $0x250] ss:$8 sps:$4 sm:$0xff]  }
  0x6c   : > { %1887 = vmatpush1.bf16.msra.mxu1 %v3010_v58  ;;  %v3112_v58 = vld [vmem:[%s4043_s1 + $0x264] ss:$8 sps:$4 sm:$0xff]  }
  0x6d   : > { %2100 = vmatpush1.bf16.msra.mxu0 %v3013_v59  ;;  %1888 = vmatprep.subr.bf16.mxu1 %v3020_v60  ;;  %v3115_v59 = vld [vmem:[%s4043_s1 + $0x564] ss:$8 sps:$4 sm:$0xff]   ;;  %v3110_v60 = vld [vmem:[%s4043_s1 + $0x260] ss:$8 sps:$4 sm:$0xff]  }
  0x6e   : > { %2101 = vmatprep.subr.bf16.mxu0 %v3025_v61  ;;  %v2484_v61 = vcombine.low %v287_v50, %v287_v50  ;;  %v3209_v50 = vld [vmem:[%s4043_s1 + $0x634] ss:$8 sps:$4 sm:$0xff]  }
  0x70   : > { %1889 = vmatpush1.bf16.msra.mxu1 %v3018_v62  ;;  %v2490_v62 = vcombine.low %v290_v51, %v290_v51  ;;  %v3210_v51 = vld [vmem:[%s3443_s17 + $0xe4] ss:$52 sps:$4 sm:$0xff]  }
  0x71   : > { %2102 = vmatpush1.bf16.msra.mxu0 %v3023_v63  ;;  %1890 = vmatprep.subr.bf16.mxu1 %v3030_v0  ;;  %v3113_v63 = vld [vmem:[%s4043_s1 + $0x560] ss:$8 sps:$4 sm:$0xff]   ;;  %v3118_v0 = vld [vmem:[%s4043_s1 + $0x274] ss:$8 sps:$4 sm:$0xff]  }
  0x72   : > { %2103 = vmatprep.subr.bf16.mxu0 %v3033_v1  ;;  %v3121_v1 = vld [vmem:[%s4043_s1 + $0x574] ss:$8 sps:$4 sm:$0xff]  }
  0x74   : > { %1891 = vmatpush1.bf16.msra.mxu1 %v3028_v2  ;;  %v3188_v2 = vld [vmem:[%s3443_s17 + $0x14] ss:$52 sps:$4 sm:$0xff]  }
  0x75   : > { %2104 = vmatpush1.bf16.msra.mxu0 %v3031_v3  ;;  %1892 = vmatprep.subr.bf16.mxu1 %v3038_v4  ;;  %v3191_v3 = vld [vmem:[%s3443_s17 + $0x2c] ss:$52 sps:$4 sm:$0xff]   ;;  %v3116_v4 = vld [vmem:[%s4043_s1 + $0x270] ss:$8 sps:$4 sm:$0xff]  }
  0x76   : > { %2105 = vmatprep.subr.bf16.mxu0 %v3043_v5  ;;  %v3119_v5 = vld [vmem:[%s4043_s1 + $0x570] ss:$8 sps:$4 sm:$0xff]  }
  0x78   : > { %1893 = vmatpush1.bf16.msra.mxu1 %v3036_v6  ;;  %v3124_v6 = vld [vmem:[%s4043_s1 + $0x284] ss:$8 sps:$4 sm:$0xff]  }
  0x79   : > { %2106 = vmatpush1.bf16.msra.mxu0 %v3041_v7  ;;  %1894 = vmatprep.subr.bf16.mxu1 %v3048_v8  ;;  %v3127_v7 = vld [vmem:[%s4043_s1 + $0x584] ss:$8 sps:$4 sm:$0xff]   ;;  %v3122_v8 = vld [vmem:[%s4043_s1 + $0x280] ss:$8 sps:$4 sm:$0xff]  }
  0x7a   : > { %2107 = vmatprep.subr.bf16.mxu0 %v3051_v9  ;;  %v3125_v9 = vld [vmem:[%s4043_s1 + $0x580] ss:$8 sps:$4 sm:$0xff]  }
  0x7c   : > { %1895 = vmatpush1.bf16.msra.mxu1 %v3046_v10  ;;  %v3130_v10 = vld [vmem:[%s4043_s1 + $0x294] ss:$8 sps:$4 sm:$0xff]  }
  0x7d   : > { %2108 = vmatpush1.bf16.msra.mxu0 %v3049_v11  ;;  %1896 = vmatprep.subr.bf16.mxu1 %v3055_v12  ;;  %v3133_v11 = vld [vmem:[%s4043_s1 + $0x594] ss:$8 sps:$4 sm:$0xff]   ;;  %v3128_v12 = vld [vmem:[%s4043_s1 + $0x290] ss:$8 sps:$4 sm:$0xff]  }
  0x7e   : > { %2109 = vmatprep.subr.bf16.mxu0 %v3059_v13  ;;  %v3131_v13 = vld [vmem:[%s4043_s1 + $0x590] ss:$8 sps:$4 sm:$0xff]  }
  0x80   : > { %1897 = vmatpush1.bf16.msra.mxu1 %v3053_v14  ;;  %v3141_v14 = vld [vmem:[%s4043_s1 + $0x2a4] ss:$8 sps:$4 sm:$0xff]  }
  0x81   : > { %2110 = vmatpush1.bf16.msra.mxu0 %v3057_v15  ;;  %1898 = vmatprep.subr.bf16.mxu1 %v3064_v16  ;;  %v3145_v15 = vld [vmem:[%s4043_s1 + $0x5a4] ss:$8 sps:$4 sm:$0xff]   ;;  %v3139_v16 = vld [vmem:[%s4043_s1 + $0x2a0] ss:$8 sps:$4 sm:$0xff]  }
  0x82   : > { %2111 = vmatprep.subr.bf16.mxu0 %v3067_v17  ;;  %v3143_v17 = vld [vmem:[%s4043_s1 + $0x5a0] ss:$8 sps:$4 sm:$0xff]  }
  0x84   : > { %1899 = vmatpush1.bf16.msra.mxu1 %v3062_v18  ;;  %v3148_v18 = vld [vmem:[%s4043_s1 + $0x2b4] ss:$8 sps:$4 sm:$0xff]  }
  0x85   : > { %2112 = vmatpush1.bf16.msra.mxu0 %v3065_v19  ;;  %1939 = vmatprep.subr.bf16.mxu1 %v3073_v20  ;;  %v3151_v19 = vld [vmem:[%s4043_s1 + $0x5b4] ss:$8 sps:$4 sm:$0xff]   ;;  %v3146_v20 = vld [vmem:[%s4043_s1 + $0x2b0] ss:$8 sps:$4 sm:$0xff]  }
  0x86   : > { %2152 = vmatprep.subr.bf16.mxu0 %v3079_v21  ;;  %v3149_v21 = vld [vmem:[%s4043_s1 + $0x5b0] ss:$8 sps:$4 sm:$0xff]  }
  0x87   : > { %1901 = vmatmul.mubr.bf16.vlgmr.msra.gmra.mrb[0].mxu1 %v3068_v22  ;;  %v3159_v22 = vld [vmem:[%s4043_s1 + $0x2c4] ss:$8 sps:$4 sm:$0xff]  }
  0x88   : > { %2114 = vmatmul.mubr.bf16.vlgmr.msra.gmra.mrb[0].mxu0 %v3074_v24  ;;  %1940 = vmatpush1.bf16.msra.mxu1 %v3071_v23  ;;  %v3163_v23 = vld [vmem:[%s4043_s1 + $0x5c4] ss:$8 sps:$4 sm:$0xff]   ;;  %v3157_v24 = vld [vmem:[%s4043_s1 + $0x2c0] ss:$8 sps:$4 sm:$0xff]  }
  0x89   : > { %2153 = vmatpush1.bf16.msra.mxu0 %v3077_v25  ;;  %1941 = vmatprep.subr.bf16.mxu1 %v3082_v26  ;;  %v3161_v25 = vld [vmem:[%s4043_s1 + $0x5c0] ss:$8 sps:$4 sm:$0xff]   ;;  %v3166_v26 = vld [vmem:[%s4043_s1 + $0x2d4] ss:$8 sps:$4 sm:$0xff]  }
  0x8a   : > { %2154 = vmatprep.subr.bf16.mxu0 %v3085_v27  ;;  %1910 = vmatprep.mubr.bf16.mxu1 %v3134_v28  ;;  %v3169_v27 = vld [vmem:[%s4043_s1 + $0x5d4] ss:$8 sps:$4 sm:$0xff]   ;;  %v3164_v28 = vld [vmem:[%s4043_s1 + $0x2d0] ss:$8 sps:$4 sm:$0xff]  }
  0x8b   : > { %2123 = vmatprep.mubr.bf16.mxu0 %v3136_v29  ;;  %v3167_v29 = vld [vmem:[%s4043_s1 + $0x5d0] ss:$8 sps:$4 sm:$0xff]  }
  0x8c   : > { %1942 = vmatpush1.bf16.msra.mxu1 %v3080_v30  ;;  %v3175_v30 = vld [vmem:[%s4043_s1 + $0x2e4] ss:$8 sps:$4 sm:$0xff]  }
  0x8d   : > { %2155 = vmatpush1.bf16.msra.mxu0 %v3083_v31  ;;  %1943 = vmatprep.subr.bf16.mxu1 %v3088_v32  ;;  %v3179_v31 = vld [vmem:[%s4043_s1 + $0x5e4] ss:$8 sps:$4 sm:$0xff]   ;;  %v3173_v32 = vld [vmem:[%s4043_s1 + $0x2e0] ss:$8 sps:$4 sm:$0xff]  }
  0x8e   : > { %2156 = vmatprep.subr.bf16.mxu0 %v3091_v33  ;;  %v3177_v33 = vld [vmem:[%s4043_s1 + $0x5e0] ss:$8 sps:$4 sm:$0xff]  }
  0x8f   : > { %1911 = vmatmul.mubr.bf16.gmra.mrb[4].mxu1 %v3138_v35  ;;  %v3185_v35 = vld [vmem:[%s4043_s1 + $0x5f4] ss:$8 sps:$4 sm:$0xff]  }
  0x90   : > { %2124 = vmatmul.mubr.bf16.gmra.mrb[4].mxu0 %v3142_v36  ;;  %1944 = vmatpush1.bf16.msra.mxu1 %v3086_v34  ;;  %v3182_v34 = vld [vmem:[%s4043_s1 + $0x2f4] ss:$8 sps:$4 sm:$0xff]   ;;  %v3180_v36 = vld [vmem:[%s4043_s1 + $0x2f0] ss:$8 sps:$4 sm:$0xff]  }
  0x91   : > { %2157 = vmatpush1.bf16.msra.mxu0 %v3089_v37  ;;  %1945 = vmatprep.subr.bf16.mxu1 %v3094_v38  ;;  %v3183_v37 = vld [vmem:[%s4043_s1 + $0x5f0] ss:$8 sps:$4 sm:$0xff]   ;;  %v3194_v38 = vld [vmem:[%s4043_s1 + $0x604] ss:$8 sps:$4 sm:$0xff]  }
  0x92   : > { %2158 = vmatprep.subr.bf16.mxu0 %v3097_v39  ;;  %1920 = vmatprep.mubr.bf16.mxu1 %v3152_v40  ;;  %v3186_v39 = vld [vmem:[%s3443_s17 + $0x10] ss:$52 sps:$4 sm:$0xff]   ;;  %v3189_v40 = vld [vmem:[%s3443_s17 + $0x28] ss:$52 sps:$4 sm:$0xff]  }
  0x93   : > { %2133 = vmatprep.mubr.bf16.mxu0 %v3154_v41  ;;  %v3192_v41 = vld [vmem:[%s4043_s1 + $0x600] ss:$8 sps:$4 sm:$0xff]  }
  0x94   : > { %1946 = vmatpush1.bf16.msra.mxu1 %v3092_v42  ;;  %v3197_v42 = vld [vmem:[%s4043_s1 + $0x614] ss:$8 sps:$4 sm:$0xff]  }
  0x95   : > { %2159 = vmatpush1.bf16.msra.mxu0 %v3095_v43  ;;  %1947 = vmatprep.subr.bf16.mxu1 %v3100_v44  ;;  %v3198_v43 = vld [vmem:[%s3443_s17 + $0x7c] ss:$52 sps:$4 sm:$0xff]   ;;  %v3200_v44 = vld [vmem:[%s3443_s17 + $0x94] ss:$52 sps:$4 sm:$0xff]  }
  0x96   : > { %2160 = vmatprep.subr.bf16.mxu0 %v3103_v45  ;;  %v3195_v45 = vld [vmem:[%s4043_s1 + $0x610] ss:$8 sps:$4 sm:$0xff]  }
  0x97   : > { %1921 = vmatmul.mubr.bf16.gmra.mrb[8].mxu1 %v3156_v48  ;;  %v3203_v48 = vld [vmem:[%s3443_s17 + $0x90] ss:$52 sps:$4 sm:$0xff]  }
  0x98   : > { %2134 = vmatmul.mubr.bf16.gmra.mrb[8].mxu0 %v3160_v49  ;;  %1948 = vmatpush1.bf16.msra.mxu1 %v3098_v46  ;;  %v3206_v46 = vld [vmem:[%s4043_s1 + $0x624] ss:$8 sps:$4 sm:$0xff]   ;;  %v3204_v49 = vld [vmem:[%s4043_s1 + $0x620] ss:$8 sps:$4 sm:$0xff]  }
  0x99   : > { %2161 = vmatpush1.bf16.msra.mxu0 %v3101_v47  ;;  %1949 = vmatprep.subr.bf16.mxu1 %v3106_v52  ;;  %v3202_v47 = vld [vmem:[%s3443_s17 + $0x78] ss:$52 sps:$4 sm:$0xff]   ;;  %v3212_v52 = vld [vmem:[%s3443_s17 + $0xfc] ss:$52 sps:$4 sm:$0xff]  }
  0x9a   : > { %2162 = vmatprep.subr.bf16.mxu0 %v3109_v53  ;;  %1930 = vmatprep.mubr.bf16.mxu1 %v2485_v54  ;;  %v3207_v53 = vld [vmem:[%s4043_s1 + $0x630] ss:$8 sps:$4 sm:$0xff]   ;;  %v3218_v54 = vld [vmem:[%s4043_s1 + $0x644] ss:$8 sps:$4 sm:$0xff]  }
  0x9b   : > { %2143 = vmatprep.mubr.bf16.mxu0 %v2491_v55  ;;  %v3214_v55 = vld [vmem:[%s3443_s17 + $0xe0] ss:$52 sps:$4 sm:$0xff]  }
  0x9c   : > { %1950 = vmatpush1.bf16.msra.mxu1 %v3104_v56  ;;  %v3215_v56 = vld [vmem:[%s3443_s17 + $0xf8] ss:$52 sps:$4 sm:$0xff]  }
  0x9d   : > { %2163 = vmatpush1.bf16.msra.mxu0 %v3107_v57  ;;  %1951 = vmatprep.subr.bf16.mxu1 %v3112_v58  ;;  %v288_v57 = vld [vmem:[%s3443_s17 + $0x148] sm:$0xff]  ;;  %v291_v58 = vld [vmem:[%s3443_s17 + $0x160] sm:$0xff] }
  0x9e   : > { %2164 = vmatprep.subr.bf16.mxu0 %v3115_v59  ;;  %v3216_v59 = vld [vmem:[%s4043_s1 + $0x640] ss:$8 sps:$4 sm:$0xff]  }
  0x9f   : > { %1931 = vmatmul.mubr.bf16.gmra.mrb[12].mxu1 %v2484_v61  ;;  %v2487_v61 = vcombine.high %v288_v57, %v288_v57 }
  0xa0   : > { %2144 = vmatmul.mubr.bf16.gmra.mrb[12].mxu0 %v2490_v62  ;;  %1952 = vmatpush1.bf16.msra.mxu1 %v3110_v60  ;;  %v3221_v60 = vld [vmem:[%s4043_s1 + $0x654] ss:$8 sps:$4 sm:$0xff]   ;;  %v2493_v62 = vcombine.high %v291_v58, %v291_v58 }
  0xa1   : > { %2165 = vmatpush1.bf16.msra.mxu0 %v3113_v63  ;;  %1953 = vmatprep.subr.bf16.mxu1 %v3118_v0  ;;  %v3219_v63 = vld [vmem:[%s4043_s1 + $0x650] ss:$8 sps:$4 sm:$0xff]   ;;  %v3228_v0 = vld [vmem:[%s4043_s1 + $0x664] ss:$8 sps:$4 sm:$0xff]  }
  0xa2   : > { %2166 = vmatprep.subr.bf16.mxu0 %v3121_v1  ;;  %1971 = vmatprep.mubr.bf16.mxu1 %v3188_v2  ;;  %v2486_v1 = vcombine.low %v288_v57, %v288_v57  ;;  %v2492_v2 = vcombine.low %v291_v58, %v291_v58 }
  0xa3   : > { %2184 = vmatprep.mubr.bf16.mxu0 %v3191_v3  ;;  %v3226_v3 = vld [vmem:[%s4043_s1 + $0x660] ss:$8 sps:$4 sm:$0xff]  }
  0xa4   : > { %1954 = vmatpush1.bf16.msra.mxu1 %v3116_v4  ;;  %v3231_v4 = vld [vmem:[%s4043_s1 + $0x674] ss:$8 sps:$4 sm:$0xff]  }
  0xa5   : > { %2167 = vmatpush1.bf16.msra.mxu0 %v3119_v5  ;;  %1955 = vmatprep.subr.bf16.mxu1 %v3124_v6  ;;  %v3229_v5 = vld [vmem:[%s4043_s1 + $0x670] ss:$8 sps:$4 sm:$0xff]   ;;  %v3260_v6 = vmov 0  }
  0xa6   : > { %2168 = vmatprep.subr.bf16.mxu0 %v3127_v7  ;;  %v3232_v7 = vld [vmem:[%s3443_s17 + $0x30] ss:$52 sps:$4 sm:$0xff]  }
  0xa8   : > { %1956 = vmatpush1.bf16.msra.mxu1 %v3122_v8  ;;  %v3233_v8 = vld [vmem:[%s3443_s17 + $0x100] ss:$52 sps:$4 sm:$0xff]  }
  0xa9   : > { %2169 = vmatpush1.bf16.msra.mxu0 %v3125_v9  ;;  %1957 = vmatprep.subr.bf16.mxu1 %v3130_v10  ;;  %v3234_v9 = vld [vmem:[%s3443_s17 + $0x98] ss:$52 sps:$4 sm:$0xff]   ;;  %v3235_v10 = vld [vmem:[%s3443_s17 + $0x168] ss:$0 sps:$4 sm:$0xff]   ;;  %s2705_s17 = sshll.u32 %s4051_s28, 4 }
  0xaa   : > { %2170 = vmatprep.subr.bf16.mxu0 %v3133_v11  ;;  %s4009_s18 = scalar_lea.vmem %s4045_s3, %s2705_s17 }
  0xac   : > { %1958 = vmatpush1.bf16.msra.mxu1 %v3128_v12 }
  0xad   : > { %2171 = vmatpush1.bf16.msra.mxu0 %v3131_v13  ;;  %1959 = vmatprep.subr.bf16.mxu1 %v3141_v14  ;;  %v503_v14 = vlaneseq }
  0xae   : > { %2172 = vmatprep.subr.bf16.mxu0 %v3145_v15 }
  0xb0   : > { %1960 = vmatpush1.bf16.msra.mxu1 %v3139_v16  ;;  %v504_v16 = vshrl.u32 %v503_v14, 7 }
  0xb1   : > { %2173 = vmatpush1.bf16.msra.mxu0 %v3143_v17  ;;  %1961 = vmatprep.subr.bf16.mxu1 %v3148_v18 }
  0xb2   : > { %2174 = vmatprep.subr.bf16.mxu0 %v3151_v19 }
  0xb4   : > { %1962 = vmatpush1.bf16.msra.mxu1 %v3146_v20  ;;  %v505_v20 = vsub.s32 0, %v504_v16 }
  0xb5   : > { %2175 = vmatpush1.bf16.msra.mxu0 %v3149_v21  ;;  %1963 = vmatprep.subr.bf16.mxu1 %v3159_v22  ;;  %v501_v22 = vld [vmem:[%s4044_s2] sm:$0x3] }
  0xb6   : > { %2176 = vmatprep.subr.bf16.mxu0 %v3163_v23  ;;  %v509_v23 = vsub.s32 1, %v504_v16 }
  0xb8   : > { %1964 = vmatpush1.bf16.msra.mxu1 %v3157_v24  ;;  %v3991_v24 = vrot.slane %v501_v22, %v505_v20 }
  0xb9   : > { %2177 = vmatpush1.bf16.msra.mxu0 %v3161_v25  ;;  %1965 = vmatprep.subr.bf16.mxu1 %v3166_v26  ;;  %v3993_v25 = vrot.slane %v501_v22, %v509_v23 }
  0xba   : > { %2178 = vmatprep.subr.bf16.mxu0 %v3169_v27 }
  0xbc   : > { %1966 = vmatpush1.bf16.msra.mxu1 %v3164_v28 }
  0xbd   : > { %2179 = vmatpush1.bf16.msra.mxu0 %v3167_v29  ;;  %1967 = vmatprep.subr.bf16.mxu1 %v3175_v30 }
  0xbe   : > { %2180 = vmatprep.subr.bf16.mxu0 %v3179_v31 }
  0xc0   : > { %1968 = vmatpush1.bf16.msra.mxu1 %v3173_v32 }
  0xc1   : > { %2181 = vmatpush1.bf16.msra.mxu0 %v3177_v33  ;;  %1969 = vmatprep.subr.bf16.mxu1 %v3182_v34 }
  0xc2   : > { %2182 = vmatprep.subr.bf16.mxu0 %v3185_v35 }
  0xc4   : > { %1970 = vmatpush1.bf16.msra.mxu1 %v3180_v36 }
  0xc5   : > { %2183 = vmatpush1.bf16.msra.mxu0 %v3183_v37  ;;  %2706 = vmatprep.subr.bf16.mxu1 %v3194_v38 }
  0xc6   : > { %2223 = vmatprep.subr.bf16.mxu0 %v3194_v38 }
  0xc7   : > { %1972 = vmatmul.mubr.bf16.vlgmr.msra.gmra.mrb[0].mxu1 %v3186_v39 }
  0xc8   : > { %2185 = vmatmul.mubr.bf16.vlgmr.msra.gmra.mrb[0].mxu0 %v3189_v40  ;;  %2714 = vmatpush1.bf16.msra.mxu1 %v3192_v41 }
  0xc9   : > { %2224 = vmatpush1.bf16.msra.mxu0 %v3192_v41  ;;  %2707 = vmatprep.subr.bf16.mxu1 %v3197_v42 }
  0xca   : > { %2225 = vmatprep.subr.bf16.mxu0 %v3197_v42  ;;  %1981 = vmatprep.mubr.bf16.mxu1 %v3198_v43 }
  0xcb   : > { %2194 = vmatprep.mubr.bf16.mxu0 %v3200_v44 }
  0xcc   : > { %2715 = vmatpush1.bf16.msra.mxu1 %v3195_v45 }
  0xcd   : > { %2226 = vmatpush1.bf16.msra.mxu0 %v3195_v45  ;;  %2708 = vmatprep.subr.bf16.mxu1 %v3206_v46 }
  0xce   : > { %2227 = vmatprep.subr.bf16.mxu0 %v3206_v46 }
  0xcf   : > { %1982 = vmatmul.mubr.bf16.gmra.mrb[4].mxu1 %v3202_v47 }
  0xd0   : > { %2195 = vmatmul.mubr.bf16.gmra.mrb[4].mxu0 %v3203_v48  ;;  %2716 = vmatpush1.bf16.msra.mxu1 %v3204_v49 }
  0xd1   : > { %2228 = vmatpush1.bf16.msra.mxu0 %v3204_v49  ;;  %2709 = vmatprep.subr.bf16.mxu1 %v3209_v50 }
  0xd2   : > { %2229 = vmatprep.subr.bf16.mxu0 %v3209_v50  ;;  %1991 = vmatprep.mubr.bf16.mxu1 %v3210_v51 }
  0xd3   : > { %2204 = vmatprep.mubr.bf16.mxu0 %v3212_v52 }
  0xd4   : > { %2717 = vmatpush1.bf16.msra.mxu1 %v3207_v53 }
  0xd5   : > { %2230 = vmatpush1.bf16.msra.mxu0 %v3207_v53  ;;  %2710 = vmatprep.subr.bf16.mxu1 %v3218_v54 }
  0xd6   : > { %2231 = vmatprep.subr.bf16.mxu0 %v3218_v54 }
  0xd7   : > { %1992 = vmatmul.mubr.bf16.gmra.mrb[8].mxu1 %v3214_v55 }
  0xd8   : > { %2205 = vmatmul.mubr.bf16.gmra.mrb[8].mxu0 %v3215_v56  ;;  %2718 = vmatpush1.bf16.msra.mxu1 %v3216_v59 }
  0xd9   : > { %2232 = vmatpush1.bf16.msra.mxu0 %v3216_v59  ;;  %2711 = vmatprep.subr.bf16.mxu1 %v3221_v60 }
  0xda   : > { %2233 = vmatprep.subr.bf16.mxu0 %v3221_v60  ;;  %2001 = vmatprep.mubr.bf16.mxu1 %v2487_v61 }
  0xdb   : > { %2214 = vmatprep.mubr.bf16.mxu0 %v2493_v62 }
  0xdc   : > { %2719 = vmatpush1.bf16.msra.mxu1 %v3219_v63 }
  0xdd   : > { %2234 = vmatpush1.bf16.msra.mxu0 %v3219_v63  ;;  %2712 = vmatprep.subr.bf16.mxu1 %v3228_v0 }
  0xde   : > { %2235 = vmatprep.subr.bf16.mxu0 %v3228_v0 }
  0xdf   : > { %2002 = vmatmul.mubr.bf16.gmra.mrb[12].mxu1 %v2486_v1 }
  0xe0   : > { %2215 = vmatmul.mubr.bf16.gmra.mrb[12].mxu0 %v2492_v2  ;;  %2720 = vmatpush1.bf16.msra.mxu1 %v3226_v3 }
  0xe1   : > { %2236 = vmatpush1.bf16.msra.mxu0 %v3226_v3  ;;  %2713 = vmatprep.subr.bf16.mxu1 %v3231_v4 }
  0xe2   : > { %2237 = vmatprep.subr.bf16.mxu0 %v3231_v4  ;;  %2255 = vmatprep.mubr.bf16.mxu0 %v3260_v6 }
  0xe3   : > { %2275 = vmatprep.mubr.bf16.mxu1 %v3260_v6 }
  0xe4   : > { %2721 = vmatpush1.bf16.msra.mxu1 %v3229_v5 }
  0xe5   : > { %2238 = vmatpush1.bf16.msra.mxu0 %v3229_v5 }
  0xe7   : > { %2276 = vmatmul.mubr.bf16.vlgmr.msra.gmra.mrb[16].mxu1 %v3233_v8 }
  0xe8   : > { %2256 = vmatmul.mubr.bf16.vlgmr.msra.gmra.mrb[0].mxu0 %v3232_v7  ;;  %2285 = vmatprep.mubr.bf16.mxu1 %v3260_v6 }
  0xe9   : > { %2265 = vmatprep.mubr.bf16.mxu0 %v3260_v6 }
  0xef   : > { %2286 = vmatmul.mubr.bf16.gmra.mrb[20].mxu1 %v3235_v10 }
  0xf0   : > { %2266 = vmatmul.mubr.bf16.gmra.mrb[4].mxu0 %v3234_v9 }
 0x19a   : > { %v1973_v11 = vpop.f32.mrb[0].mxu1 }
 0x19b   : > { %v1975_v12 = vpop.f32.mrb[1].mxu1  ;;  %v2722_v54 = vadd.f32 %v1973_v11, %v3991_v24 }
 0x19c   : > { %v1977_v13 = vpop.f32.mrb[2].mxu1  ;;  %v2724_v55 = vadd.f32 %v1975_v12, %v3993_v25 }
 0x19d   : > { %v1979_v15 = vpop.f32.mrb[3].mxu1  ;;  %v2726_v58 = vadd.f32 %v1977_v13, %v3991_v24 }
 0x19e   : > { %v2728_v63 = vadd.f32 %v1979_v15, %v3993_v25 }
 0x1a2   : > { %v3980_v17 = vpop.f32.mrb[4].mxu1 }
 0x1a3   : > { %v3982_v18 = vpop.f32.mrb[5].mxu1  ;;  %v2730_v22 = vadd.f32 %v3980_v17, %v3991_v24 }
 0x1a4   : > { %v3984_v19 = vpop.f32.mrb[6].mxu1  ;;  %v2732_v23 = vadd.f32 %v3982_v18, %v3993_v25 }
 0x1a5   : > { %v3986_v21 = vpop.f32.mrb[7].mxu1 }
 0x1a6   : > { %v2736_v17 = vadd.f32 %v3986_v21, %v3993_v25 }
 0x1aa   : > { %v1993_v26 = vpop.f32.mrb[8].mxu1 }
 0x1ab   : > { %v2206_v27 = vpop.f32.mrb[8].mxu0  ;;  %v2738_v28 = vadd.f32 %v1993_v26, %v3991_v24  ;;  %v1995_v29 = vpop.f32.mrb[9].mxu1 }
 0x1ac   : > { %v2208_v30 = vpop.f32.mrb[9].mxu0  ;;  %v2741_v31 = vadd.f32 %v1995_v29, %v3993_v25  ;;  %v1997_v32 = vpop.f32.mrb[10].mxu1 }
 0x1ad   : > { %v2210_v33 = vpop.f32.mrb[10].mxu0  ;;  %v2739_v34 = vadd.f32 %v2738_v28, %v2206_v27  ;;  %v2744_v35 = vadd.f32 %v1997_v32, %v3991_v24  ;;  %v1999_v36 = vpop.f32.mrb[11].mxu1  ;;  %v2734_v28 = vadd.f32 %v3984_v19, %v3991_v24 }
 0x1ae   : > { %v2212_v37 = vpop.f32.mrb[11].mxu0  ;;  %v2742_v38 = vadd.f32 %v2741_v31, %v2208_v30  ;;  %v2747_v39 = vadd.f32 %v1999_v36, %v3993_v25 }
 0x1af   : > { %v2745_v40 = vadd.f32 %v2744_v35, %v2210_v33 }
 0x1b0   : > { %v2748_v41 = vadd.f32 %v2747_v39, %v2212_v37 }
 0x1b2   : > { %v2003_v42 = vpop.f32.mrb[12].mxu1 }
 0x1b3   : > { %v2216_v43 = vpop.f32.mrb[12].mxu0  ;;  %v2750_v44 = vadd.f32 %v2003_v42, %v3991_v24  ;;  %v2005_v45 = vpop.f32.mrb[13].mxu1 }
 0x1b4   : > { %v2218_v46 = vpop.f32.mrb[13].mxu0  ;;  %v2753_v47 = vadd.f32 %v2005_v45, %v3993_v25  ;;  %v2007_v48 = vpop.f32.mrb[14].mxu1 }
 0x1b5   : > { %v2220_v49 = vpop.f32.mrb[14].mxu0  ;;  %v2751_v50 = vadd.f32 %v2750_v44, %v2216_v43  ;;  %v2008_v51 = vpop.f32.mrb[15].mxu1 }
 0x1b6   : > { %v2221_v52 = vpop.f32.mrb[15].mxu0  ;;  %v2754_v53 = vadd.f32 %v2753_v47, %v2218_v46 }
 0x1ba   : > { %v2277_v57 = vpop.f32.mrb[16].mxu1 }
 0x1bb   : > { %v2257_v56 = vpop.f32.mrb[0].mxu0  ;;  %v2740_v60 = vadd.f32 %v2739_v34, %v2277_v57  ;;  %v2279_v62 = vpop.f32.mrb[17].mxu1 }
 0x1bc   : > { %v2723_v59 = vadd.f32 %v2722_v54, %v2257_v56  ;;  %v2259_v61 = vpop.f32.mrb[1].mxu0  ;;  %v2743_v1 = vadd.f32 %v2742_v38, %v2279_v62  ;;  %v2281_v3 = vpop.f32.mrb[18].mxu1 }
 0x1bd   : > { %v2725_v0 = vadd.f32 %v2724_v55, %v2259_v61  ;;  %v2261_v2 = vpop.f32.mrb[2].mxu0  ;;  %v2302_v5 = vmax.f32 %v2740_v60, 0.0  ;;  %v2746_v7 = vadd.f32 %v2745_v40, %v2281_v3  ;;  %v2283_v9 = vpop.f32.mrb[19].mxu1 }
 0x1be   : > { %v2294_v4 = vmax.f32 %v2723_v59, 0.0  ;;  %v2727_v6 = vadd.f32 %v2726_v58, %v2261_v2  ;;  %v2263_v8 = vpop.f32.mrb[3].mxu0  ;;  %v2303_v11 = vmax.f32 %v2743_v1, 0.0  ;;  %v2749_v13 = vadd.f32 %v2748_v41, %v2283_v9 }
 0x1bf   : > { %v2295_v10 = vmax.f32 %v2725_v0, 0.0  ;;  %v2729_v12 = vadd.f32 %v2728_v63, %v2263_v8  ;;  %2316 = vst [vmem:[%s4009_s18 + $0x40] sm:$0xff] %v2302_v5  ;;  %v2304_v15 = vmax.f32 %v2746_v7, 0.0 }
 0x1c0   : > { %2308 = vst [vmem:[%s4009_s18] sm:$0xff] %v2294_v4  ;;  %v2296_v14 = vmax.f32 %v2727_v6, 0.0  ;;  %2317 = vst [vmem:[%s4009_s18 + $0x48] sm:$0xff] %v2303_v11  ;;  %v2305_v20 = vmax.f32 %v2749_v13, 0.0 }
 0x1c1   : > { %2309 = vst [vmem:[%s4009_s18 + $0x8] sm:$0xff] %v2295_v10  ;;  %v2297_v16 = vmax.f32 %v2729_v12, 0.0  ;;  %2318 = vst [vmem:[%s4009_s18 + $0x50] sm:$0xff] %v2304_v15 }
 0x1c2   : > { %2310 = vst [vmem:[%s4009_s18 + $0x10] sm:$0xff] %v2296_v14  ;;  %2319 = vst [vmem:[%s4009_s18 + $0x58] sm:$0xff] %v2305_v20  ;;  %v2287_v27 = vpop.f32.mrb[20].mxu1 }
 0x1c3   : > { %2311 = vst [vmem:[%s4009_s18 + $0x18] sm:$0xff] %v2297_v16  ;;  %v2267_v26 = vpop.f32.mrb[4].mxu0  ;;  %v2752_v30 = vadd.f32 %v2751_v50, %v2287_v27  ;;  %v2289_v32 = vpop.f32.mrb[21].mxu1 }
 0x1c4   : > { %v2731_v29 = vadd.f32 %v2730_v22, %v2267_v26  ;;  %v2269_v31 = vpop.f32.mrb[5].mxu0  ;;  %v2755_v18 = vadd.f32 %v2754_v53, %v2289_v32  ;;  %v2291_v35 = vpop.f32.mrb[22].mxu1 }
 0x1c5   : > { %v2733_v33 = vadd.f32 %v2732_v23, %v2269_v31  ;;  %v2271_v34 = vpop.f32.mrb[6].mxu0  ;;  %v2306_v37 = vmax.f32 %v2752_v30, 0.0  ;;  %v2292_v38 = vpop.f32.mrb[23].mxu1 }
 0x1c6   : > { %v2298_v36 = vmax.f32 %v2731_v29, 0.0  ;;  %v2735_v19 = vadd.f32 %v2734_v28, %v2271_v34  ;;  %v2273_v24 = vpop.f32.mrb[7].mxu0  ;;  %v2307_v40 = vmax.f32 %v2755_v18, 0.0 }
 0x1c7   : > { %v2299_v39 = vmax.f32 %v2733_v33, 0.0  ;;  %v2737_v41 = vadd.f32 %v2736_v17, %v2273_v24  ;;  %2320 = vst [vmem:[%s4009_s18 + $0x60] sm:$0xff] %v2306_v37 }
 0x1c8   : > { %2312 = vst [vmem:[%s4009_s18 + $0x20] sm:$0xff] %v2298_v36  ;;  %v2300_v42 = vmax.f32 %v2735_v19, 0.0  ;;  %2321 = vst [vmem:[%s4009_s18 + $0x68] sm:$0xff] %v2307_v40 }
 0x1c9   : > { %2313 = vst [vmem:[%s4009_s18 + $0x28] sm:$0xff] %v2299_v39  ;;  %v2301_v21 = vmax.f32 %v2737_v41, 0.0 }
 0x1ca   : > { %2314 = vst [vmem:[%s4009_s18 + $0x30] sm:$0xff] %v2300_v42 }
 0x1cb   : > { %2315 = vst [vmem:[%s4009_s18 + $0x38] sm:$0xff] %v2301_v21 }
 0x1cc PF: > { %s13_s14 = sadd.s32 1, %s3258_s14   ;;  %s4046_s12 = smov %s3254_s13 }
 0x1cd   : > { %p10_p5 = scmp.ge.s32.totalorder %s13_s14, 4   ;;  %s4047_s13 = smov %s4049_s15 }
 0x1cf   :  { %12 = sbr.rel (!%p10_p5) target bundleno = 2 (0x2), region = 68 }

</bundles_post_ra>
